<compile_context>
chip_gen: v7x
topology: tpu7x:2x2x1
jax: 0.10.0
libtpu: 0.0.40
codegen_flags: <defaults>
</compile_context>

<pallas_src>
import functools

import jax
import jax.numpy as jnp
from jax.experimental import pallas as pl
from jax.experimental.pallas import tpu as pltpu

_TM_MAX = 512  # M-tile for the conv matmul / maxpool kernels


def _round_up(x, m):
    return -(-x // m) * m


# ----------------------------------------------------------------------------
# Pallas kernels
# ----------------------------------------------------------------------------
def _conv_mm_kernel(a_ref, w_ref, b_ref, o_ref, *, relu):
    # fused conv-as-matmul (bf16 MXU) + folded-BN bias + optional ReLU epilogue (f32)
    acc = jnp.dot(a_ref[...], w_ref[...], preferred_element_type=jnp.float32)
    y = acc + b_ref[...]
    if relu:
        y = jnp.maximum(y, 0.0)
    o_ref[...] = y


def _maxpool_kernel(x_ref, o_ref):
    # reduce the 3x3 window axis of the [M, 9, C] patch view (no host-side transpose)
    o_ref[...] = jnp.max(x_ref[...], axis=1)


def _se_residual_kernel(x_ref, w1_ref, b1_ref, w2_ref, b2_ref, id_ref, o_ref):
    # Squeeze-Excitation + residual add + ReLU, fully fused:
    # GAP -> fc1 -> ReLU -> fc2 -> sigmoid -> channel rescale -> + identity -> ReLU
    x = x_ref[...]                                     # [B, HW, C]
    s = jnp.mean(x, axis=1)                            # [B, C]
    h = jnp.maximum(
        jnp.dot(s, w1_ref[...], preferred_element_type=jnp.float32) + b1_ref[...], 0.0)
    g = jax.nn.sigmoid(
        jnp.dot(h, w2_ref[...], preferred_element_type=jnp.float32) + b2_ref[...])
    o_ref[...] = jnp.maximum(x * g[:, None, :] + id_ref[...], 0.0)


def _heads_kernel(x_ref, w_ref, b_ref, o_ref):
    # three BengaliHeads fused: one GAP + one matmul against concatenated (padded) weights
    s = jnp.mean(x_ref[...], axis=1)                   # [B, C]
    o_ref[...] = jnp.dot(s, w_ref[...], preferred_element_type=jnp.float32) + b_ref[...]


# ----------------------------------------------------------------------------
# pallas_call wrappers
# ----------------------------------------------------------------------------
def _full_call(kernel, out_shape, *args):
    # one full-array block per operand; used only for the (inherently global) SE / head
    # kernels at these small sizes.
    def spec(shape):
        nd = len(shape)
        return pl.BlockSpec(shape, lambda i, _nd=nd: (0,) * _nd)

    return pl.pallas_call(
        kernel,
        grid=(1,),
        out_shape=jax.ShapeDtypeStruct(out_shape, jnp.float32),
        in_specs=[spec(a.shape) for a in args],
        out_specs=spec(out_shape),
        compiler_params=pltpu.CompilerParams(dimension_semantics=("arbitrary",)),
    )(*args)


def _matmul_bias_act(a, w_bf16, bias, relu):
    # [M, K] x [K, N] conv matmul, M-tiled with a "parallel" grid axis, bf16 inputs,
    # f32 accumulation, fused bias (+ ReLU) epilogue.
    m, k = a.shape
    n = w_bf16.shape[1]
    tm = min(_TM_MAX, _round_up(m, 8))
    mp = _round_up(m, tm)
    a = a.astype(jnp.bfloat16)
    if mp != m:
        a = jnp.pad(a, ((0, mp - m), (0, 0)))
    out = pl.pallas_call(
        functools.partial(_conv_mm_kernel, relu=relu),
        grid=(mp // tm,),
        out_shape=jax.ShapeDtypeStruct((mp, n), jnp.float32),
        in_specs=[pl.BlockSpec((tm, k), lambda i: (i, 0)),
                  pl.BlockSpec((k, n), lambda i: (0, 0)),
                  pl.BlockSpec((1, n), lambda i: (0, 0))],
        out_specs=pl.BlockSpec((tm, n), lambda i: (i, 0)),
        compiler_params=pltpu.CompilerParams(dimension_semantics=("parallel",)),
    )(a, w_bf16, bias)
    return out[:m] if mp != m else out


# ----------------------------------------------------------------------------
# plain-JAX glue (layout / patch extraction only; compute stays in kernels)
# ----------------------------------------------------------------------------
def _im2col(x, kh, kw, stride, pad, pad_value=0.0):
    # x: [B, H, W, C] -> patches [B, Ho, Wo, kh*kw*C]; column order = ((ki*kw+kj)*C + c),
    # which matches the folded weight reshape and the block-diagonal grouped weight.
    b, h, w, c = x.shape
    xp = jnp.pad(x, ((0, 0), (pad, pad), (pad, pad), (0, 0)), constant_values=pad_value)
    ho = (h + 2 * pad - kh) // stride + 1
    wo = (w + 2 * pad - kw) // stride + 1
    cols = []
    for i in range(kh):
        for j in range(kw):
            cols.append(xp[:, i:i + stride * (ho - 1) + 1:stride,
                              j:j + stride * (wo - 1) + 1:stride, :])
    return jnp.concatenate(cols, axis=-1), ho, wo


def conv_bn(x, wb, kh, kw, stride, pad, relu):
    # conv (as matmul) with BN folded into weight/bias; bias + ReLU fused in the kernel
    w2, bias = wb
    b, h, w_, c = x.shape
    if kh == 1 and kw == 1 and pad == 0:
        patches = x[:, ::stride, ::stride, :]          # 1x1 conv: no im2col expansion
        ho, wo = patches.shape[1], patches.shape[2]
    else:
        patches, ho, wo = _im2col(x, kh, kw, stride, pad)
    a2 = patches.reshape(b * ho * wo, kh * kw * c)
    out = _matmul_bias_act(a2, w2, bias, relu)
    return out.reshape(b, ho, wo, w2.shape[1])


def maxpool2d(x, k=3, stride=2, pad=1):
    b, h, w_, c = x.shape
    patches, ho, wo = _im2col(x, k, k, stride, pad, pad_value=-jnp.inf)
    m = b * ho * wo
    stacked = patches.reshape(m, k * k, c)             # contiguous view, no transpose
    tm = min(_TM_MAX, _round_up(m, 8))
    mp = _round_up(m, tm)
    if mp != m:
        stacked = jnp.pad(stacked, ((0, mp - m), (0, 0), (0, 0)))
    out = pl.pallas_call(
        _maxpool_kernel,
        grid=(mp // tm,),
        out_shape=jax.ShapeDtypeStruct((mp, c), jnp.float32),
        in_specs=[pl.BlockSpec((tm, k * k, c), lambda i: (i, 0, 0))],
        out_specs=pl.BlockSpec((tm, c), lambda i: (i, 0)),
        compiler_params=pltpu.CompilerParams(dimension_semantics=("parallel",)),
    )(stacked)
    if mp != m:
        out = out[:m]
    return out.reshape(b, ho, wo, c)


# ----------------------------------------------------------------------------
# model: raw parameters, prepared (folded/packed) parameters, forward
# ----------------------------------------------------------------------------
def init_params(key):
    ks = iter(jax.random.split(key, 128))

    def nrm(shape, scale=0.1):
        return scale * jax.random.normal(next(ks), shape, dtype=jnp.float32)

    def bn(c):
        return (1.0 + 0.05 * jax.random.normal(next(ks), (c,), jnp.float32),           # gamma
                0.05 * jax.random.normal(next(ks), (c,), jnp.float32),                 # beta
                0.05 * jax.random.normal(next(ks), (c,), jnp.float32),                 # running mean
                1.0 + 0.05 * jnp.abs(jax.random.normal(next(ks), (c,), jnp.float32)))  # running var

    def make_block(cin, mid, cout, stride, groups=4, r=4):
        cg = mid // groups
        return {
            'stride': stride,
            'w1': nrm((1, 1, cin, mid)), 'bn1': bn(mid),
            'w2_groups': [nrm((3, 3, cg, cg)) for _ in range(groups)], 'bn2': bn(mid),
            'w3': nrm((1, 1, mid, cout)), 'bn3': bn(cout),
            'se_w1': nrm((cout, cout // r)), 'se_b1': nrm((cout // r,)),
            'se_w2': nrm((cout // r, cout)), 'se_b2': nrm((cout,)),
            'down_w': nrm((1, 1, cin, cout)), 'down_bn': bn(cout),
        }

    c0 = 16
    params = {
        # model.layer0.conv1 rebuilt for 1 input channel (7x7, stride 2, pad 3, no bias)
        'stem_w': nrm((7, 7, 1, c0)),
        'stem_bn': bn(c0),
        'blocks': [make_block(16, 16, 32, stride=1),
                   make_block(32, 32, 64, stride=2)],
    }
    nc = 64  # backbone feature channels ("nc = last_linear.in_features" analogue)
    for idx, n_out in zip((1, 2, 3), (168, 11, 7)):
        params[f'head{idx}_w'] = nrm((nc, n_out))
        params[f'head{idx}_b'] = nrm((n_out,))
    return params


def prepare_params(p):
    """One-time prep: fold BN into conv weights/bias, build bf16 matmul-ready matrices,
    block-diagonalize the grouped conv, concatenate+pad the head weights."""
    def bn_fold(bn):
        gamma, beta, mean, var = bn
        scale = gamma / jnp.sqrt(var + 1e-5)
        return scale, beta - mean * scale

    def fold_conv(w, bn):
        scale, bias = bn_fold(bn)
        kh, kw, cin, cout = w.shape
        w2 = (w * scale).reshape(kh * kw * cin, cout).astype(jnp.bfloat16)
        return w2, bias.reshape(1, cout).astype(jnp.float32)

    def fold_grouped(w_groups, bn):
        # block-diagonal [kh*kw*C, C] matrix matching the im2col column order
        # ((ki*kw+kj)*C + c), so the whole grouped conv is one MXU matmul.
        scale, bias = bn_fold(bn)
        g = len(w_groups)
        kh, kw, cg, _ = w_groups[0].shape
        C = g * cg
        W = jnp.zeros((kh * kw * C, C), jnp.float32)
        for gi in range(g):
            wg = w_groups[gi] * scale[gi * cg:(gi + 1) * cg]
            for ki in range(kh):
                for kj in range(kw):
                    r0 = (ki * kw + kj) * C + gi * cg
                    W = W.at[r0:r0 + cg, gi * cg:(gi + 1) * cg].set(wg[ki, kj])
        return W.astype(jnp.bfloat16), bias.reshape(1, C).astype(jnp.float32)

    prep = {'stem': fold_conv(p['stem_w'], p['stem_bn']), 'blocks': []}
    for blk in p['blocks']:
        prep['blocks'].append({
            'stride': blk['stride'],
            'c1': fold_conv(blk['w1'], blk['bn1']),
            'c2': fold_grouped(blk['w2_groups'], blk['bn2']),
            'c3': fold_conv(blk['w3'], blk['bn3']),
            'down': fold_conv(blk['down_w'], blk['down_bn']),
            'se_w1': blk['se_w1'], 'se_b1': blk['se_b1'].reshape(1, -1),
            'se_w2': blk['se_w2'], 'se_b2': blk['se_b2'].reshape(1, -1),
        })

    # three heads -> one GAP + one matmul; pad N = 168+11+7 = 186 up to 256 (lane-dense)
    n_out = (168, 11, 7)
    w_cat = jnp.concatenate([p[f'head{i}_w'] for i in (1, 2, 3)], axis=1)
    b_cat = jnp.concatenate([p[f'head{i}_b'] for i in (1, 2, 3)], axis=0)
    n_tot = w_cat.shape[1]
    n_pad = _round_up(n_tot, 128)
    prep['heads_w'] = jnp.pad(w_cat, ((0, 0), (0, n_pad - n_tot)))
    prep['heads_b'] = jnp.pad(b_cat, (0, n_pad - n_tot)).reshape(1, n_pad)
    prep['head_splits'] = n_out
    return prep


def se_bottleneck(x, blk):
    stride = blk['stride']
    identity = conv_bn(x, blk['down'], 1, 1, stride, 0, relu=False)   # 1x1 downsample + BN
    out = conv_bn(x, blk['c1'], 1, 1, 1, 0, relu=True)                # 1x1 reduce + BN + ReLU
    out = conv_bn(out, blk['c2'], 3, 3, stride, 1, relu=True)         # grouped 3x3 (block-diag) + BN + ReLU
    out = conv_bn(out, blk['c3'], 1, 1, 1, 0, relu=False)             # 1x1 expand + BN
    b, h, w_, c = out.shape
    y = _full_call(_se_residual_kernel, (b, h * w_, c),
                   out.reshape(b, h * w_, c),
                   blk['se_w1'], blk['se_b1'], blk['se_w2'], blk['se_b2'],
                   identity.reshape(b, h * w_, c))
    return y.reshape(b, h, w_, c)


def seresnext_forward(prep, x_nchw):
    # PyTorch NCHW -> NHWC (kernel layout)
    x = jnp.transpose(x_nchw, (0, 2, 3, 1)).astype(jnp.float32)

    # base = model.children()[:-2]  (stem + residual stages, no avgpool / no last_linear)
    x = conv_bn(x, prep['stem'], 7, 7, 2, 3, relu=True)
    x = maxpool2d(x, 3, 2, 1)
    for blk in prep['blocks']:
        x = se_bottleneck(x, blk)

    # three BengaliHeads fused into a single kernel (one GAP, padded lane-dense matmul)
    b, h, w_, c = x.shape
    logits = _full_call(_heads_kernel, (b, prep['heads_w'].shape[1]),
                        x.reshape(b, h * w_, c), prep['heads_w'], prep['heads_b'])
    n1, n2, n3 = prep['head_splits']
    return (logits[:, :n1],
            logits[:, n1:n1 + n2],
            logits[:, n1 + n2:n1 + n2 + n3])


if __name__ == "__main__":
    key = jax.random.PRNGKey(0)
    pkey, xkey = jax.random.split(key)
    params = init_params(pkey)
    prep = prepare_params(params)   # BN folding / weight packing done once, off the hot path

    # grayscale input (the module rebuilds conv1 for 1 channel), NCHW like PyTorch
    x = jax.random.normal(xkey, (2, 1, 16, 16), dtype=jnp.float32)

    fwd = jax.jit(functools.partial(seresnext_forward, prep))
    y1, y2, y3 = fwd(x)
    jax.block_until_ready((y1, y2, y3))

    assert y1.shape == (2, 168), y1.shape
    assert y2.shape == (2, 11), y2.shape
    assert y3.shape == (2, 7), y3.shape
    assert all(bool(jnp.all(jnp.isfinite(y))) for y in (y1, y2, y3))
    print("KERNEL_OK")
</pallas_src>

<mosaic_0001>
module attributes {stable_mosaic.version = 11 : i64} {
  func.func @_conv_mm_kernel(%arg0: i32, %arg1: memref<128x49xbf16, #tpu.memory_space<vmem>>, %arg2: memref<49x16xbf16, #tpu.memory_space<vmem>>, %arg3: memref<1x16xf32, #tpu.memory_space<vmem>>, %arg4: memref<128x16xf32, #tpu.memory_space<vmem>>) attributes {dimension_semantics = [#tpu.dimension_semantics<parallel>], iteration_bounds = array<i64: 1>, scalar_prefetch = 0 : i64, scratch_operands = 0 : i64, tpu.core_type = #tpu.core_type<tc>, window_params = [{transform_indices = @transform_0, window_bounds = array<i64: 128, 49>}, {pipeline_mode = #tpu.pipeline_mode<synchronous>, transform_indices = @transform_1, window_bounds = array<i64: 49, 16>}, {pipeline_mode = #tpu.pipeline_mode<synchronous>, transform_indices = @transform_2, window_bounds = array<i64: 1, 16>}, {transform_indices = @transform_3, window_bounds = array<i64: 128, 16>}]} {
    %c0 = arith.constant 0 : index
    %c0_0 = arith.constant 0 : index
    %0 = vector.load %arg1[%c0, %c0_0] : memref<128x49xbf16, #tpu.memory_space<vmem>>, vector<128x49xbf16>
    %c0_1 = arith.constant 0 : index
    %c0_2 = arith.constant 0 : index
    %1 = vector.load %arg2[%c0_1, %c0_2] : memref<49x16xbf16, #tpu.memory_space<vmem>>, vector<49x16xbf16>
    %cst = arith.constant dense<0.000000e+00> : vector<128x16xf32>
    %2 = tpu.matmul %0, %1, %cst {dimension_numbers = #tpu.dot_dimension_numbers<[1], [0], [0], [1], [0, 0, 1, 1], [], []>} : vector<128x49xbf16>, vector<49x16xbf16>, vector<128x16xf32> -> vector<128x16xf32>
    %c0_3 = arith.constant 0 : index
    %c0_4 = arith.constant 0 : index
    %3 = vector.load %arg3[%c0_3, %c0_4] : memref<1x16xf32, #tpu.memory_space<vmem>>, vector<1x16xf32>
    %4 = vector.broadcast %3 : vector<1x16xf32> to vector<128x16xf32>
    %5 = arith.addf %2, %4 : vector<128x16xf32>
    %cst_5 = arith.constant 0.000000e+00 : f32
    %6 = vector.broadcast %cst_5 : f32 to vector<128x16xf32>
    %7 = arith.maximumf %5, %6 : vector<128x16xf32>
    %c0_6 = arith.constant 0 : index
    %c0_7 = arith.constant 0 : index
    %8 = vector.load %arg4[%c0_6, %c0_7] : memref<128x16xf32, #tpu.memory_space<vmem>>, vector<128x16xf32>
    tpu.vector_store %arg4[%c0_6, %c0_7], %7 {strides = array<i32>} : memref<128x16xf32, #tpu.memory_space<vmem>>, vector<128x16xf32>,
    return
  }
  func.func @transform_0(%arg0: i32) -> (i32, i32) {
    %c0_i32 = arith.constant 0 : i32
    %c0_i32_0 = arith.constant 0 : i32
    return %arg0, %c0_i32 : i32, i32
  }
  func.func @transform_1(%arg0: i32) -> (i32, i32) {
    %c0_i32 = arith.constant 0 : i32
    %c0_i32_0 = arith.constant 0 : i32
    %c0_i32_1 = arith.constant 0 : i32
    return %c0_i32, %c0_i32_0 : i32, i32
  }
  func.func @transform_2(%arg0: i32) -> (i32, i32) {
    %c0_i32 = arith.constant 0 : i32
    %c0_i32_0 = arith.constant 0 : i32
    %c0_i32_1 = arith.constant 0 : i32
    return %c0_i32, %c0_i32_0 : i32, i32
  }
  func.func @transform_3(%arg0: i32) -> (i32, i32) {
    %c0_i32 = arith.constant 0 : i32
    %c0_i32_0 = arith.constant 0 : i32
    return %arg0, %c0_i32 : i32, i32
  }
}

module attributes {stable_mosaic.version = 11 : i64} {
  func.func @_maxpool_kernel(%arg0: i32, %arg1: memref<32x9x16xf32, #tpu.memory_space<vmem>>, %arg2: memref<32x16xf32, #tpu.memory_space<vmem>>) attributes {dimension_semantics = [#tpu.dimension_semantics<parallel>], iteration_bounds = array<i64: 1>, scalar_prefetch = 0 : i64, scratch_operands = 0 : i64, tpu.core_type = #tpu.core_type<tc>, window_params = [{transform_indices = @transform_0, window_bounds = array<i64: 32, 9, 16>}, {transform_indices = @transform_1, window_bounds = array<i64: 32, 16>}]} {
    %c0 = arith.constant 0 : index
    %c0_0 = arith.constant 0 : index
    %c0_1 = arith.constant 0 : index
    %0 = vector.load %arg1[%c0, %c0_0, %c0_1] : memref<32x9x16xf32, #tpu.memory_space<vmem>>, vector<32x9x16xf32>
    %cst = arith.constant dense<0xFF800000> : vector<32x16xf32>
    %1 = vector.multi_reduction <maximumf>, %0, %cst [1] : vector<32x9x16xf32> to vector<32x16xf32>
    %c0_2 = arith.constant 0 : index
    %c0_3 = arith.constant 0 : index
    %2 = vector.load %arg2[%c0_2, %c0_3] : memref<32x16xf32, #tpu.memory_space<vmem>>, vector<32x16xf32>
    tpu.vector_store %arg2[%c0_2, %c0_3], %1 {strides = array<i32>} : memref<32x16xf32, #tpu.memory_space<vmem>>, vector<32x16xf32>,
    return
  }
  func.func @transform_0(%arg0: i32) -> (i32, i32, i32) {
    %c0_i32 = arith.constant 0 : i32
    %c0_i32_0 = arith.constant 0 : i32
    %c0_i32_1 = arith.constant 0 : i32
    return %arg0, %c0_i32, %c0_i32_0 : i32, i32, i32
  }
  func.func @transform_1(%arg0: i32) -> (i32, i32) {
    %c0_i32 = arith.constant 0 : i32
    %c0_i32_0 = arith.constant 0 : i32
    return %arg0, %c0_i32 : i32, i32
  }
}

module attributes {stable_mosaic.version = 11 : i64} {
  func.func @_conv_mm_kernel(%arg0: i32, %arg1: memref<32x16xbf16, #tpu.memory_space<vmem>>, %arg2: memref<16x16xbf16, #tpu.memory_space<vmem>>, %arg3: memref<1x16xf32, #tpu.memory_space<vmem>>, %arg4: memref<32x16xf32, #tpu.memory_space<vmem>>) attributes {dimension_semantics = [#tpu.dimension_semantics<parallel>], iteration_bounds = array<i64: 1>, scalar_prefetch = 0 : i64, scratch_operands = 0 : i64, tpu.core_type = #tpu.core_type<tc>, window_params = [{transform_indices = @transform_0, window_bounds = array<i64: 32, 16>}, {pipeline_mode = #tpu.pipeline_mode<synchronous>, transform_indices = @transform_1, window_bounds = array<i64: 16, 16>}, {pipeline_mode = #tpu.pipeline_mode<synchronous>, transform_indices = @transform_2, window_bounds = array<i64: 1, 16>}, {transform_indices = @transform_3, window_bounds = array<i64: 32, 16>}]} {
    %c0 = arith.constant 0 : index
    %c0_0 = arith.constant 0 : index
    %0 = vector.load %arg1[%c0, %c0_0] : memref<32x16xbf16, #tpu.memory_space<vmem>>, vector<32x16xbf16>
    %c0_1 = arith.constant 0 : index
    %c0_2 = arith.constant 0 : index
    %1 = vector.load %arg2[%c0_1, %c0_2] : memref<16x16xbf16, #tpu.memory_space<vmem>>, vector<16x16xbf16>
    %cst = arith.constant dense<0.000000e+00> : vector<32x16xf32>
    %2 = tpu.matmul %0, %1, %cst {dimension_numbers = #tpu.dot_dimension_numbers<[1], [0], [0], [1], [0, 0, 1, 1], [], []>} : vector<32x16xbf16>, vector<16x16xbf16>, vector<32x16xf32> -> vector<32x16xf32>
    %c0_3 = arith.constant 0 : index
    %c0_4 = arith.constant 0 : index
    %3 = vector.load %arg3[%c0_3, %c0_4] : memref<1x16xf32, #tpu.memory_space<vmem>>, vector<1x16xf32>
    %4 = vector.broadcast %3 : vector<1x16xf32> to vector<32x16xf32>
    %5 = arith.addf %2, %4 : vector<32x16xf32>
    %cst_5 = arith.constant 0.000000e+00 : f32
    %6 = vector.broadcast %cst_5 : f32 to vector<32x16xf32>
    %7 = arith.maximumf %5, %6 : vector<32x16xf32>
    %c0_6 = arith.constant 0 : index
    %c0_7 = arith.constant 0 : index
    %8 = vector.load %arg4[%c0_6, %c0_7] : memref<32x16xf32, #tpu.memory_space<vmem>>, vector<32x16xf32>
    tpu.vector_store %arg4[%c0_6, %c0_7], %7 {strides = array<i32>} : memref<32x16xf32, #tpu.memory_space<vmem>>, vector<32x16xf32>,
    return
  }
  func.func @transform_0(%arg0: i32) -> (i32, i32) {
    %c0_i32 = arith.constant 0 : i32
    %c0_i32_0 = arith.constant 0 : i32
    return %arg0, %c0_i32 : i32, i32
  }
  func.func @transform_1(%arg0: i32) -> (i32, i32) {
    %c0_i32 = arith.constant 0 : i32
    %c0_i32_0 = arith.constant 0 : i32
    %c0_i32_1 = arith.constant 0 : i32
    return %c0_i32, %c0_i32_0 : i32, i32
  }
  func.func @transform_2(%arg0: i32) -> (i32, i32) {
    %c0_i32 = arith.constant 0 : i32
    %c0_i32_0 = arith.constant 0 : i32
    %c0_i32_1 = arith.constant 0 : i32
    return %c0_i32, %c0_i32_0 : i32, i32
  }
  func.func @transform_3(%arg0: i32) -> (i32, i32) {
    %c0_i32 = arith.constant 0 : i32
    %c0_i32_0 = arith.constant 0 : i32
    return %arg0, %c0_i32 : i32, i32
  }
}

module attributes {stable_mosaic.version = 11 : i64} {
  func.func @_conv_mm_kernel(%arg0: i32, %arg1: memref<32x16xbf16, #tpu.memory_space<vmem>>, %arg2: memref<16x32xbf16, #tpu.memory_space<vmem>>, %arg3: memref<1x32xf32, #tpu.memory_space<vmem>>, %arg4: memref<32x32xf32, #tpu.memory_space<vmem>>) attributes {dimension_semantics = [#tpu.dimension_semantics<parallel>], iteration_bounds = array<i64: 1>, scalar_prefetch = 0 : i64, scratch_operands = 0 : i64, tpu.core_type = #tpu.core_type<tc>, window_params = [{transform_indices = @transform_0, window_bounds = array<i64: 32, 16>}, {pipeline_mode = #tpu.pipeline_mode<synchronous>, transform_indices = @transform_1, window_bounds = array<i64: 16, 32>}, {pipeline_mode = #tpu.pipeline_mode<synchronous>, transform_indices = @transform_2, window_bounds = array<i64: 1, 32>}, {transform_indices = @transform_3, window_bounds = array<i64: 32, 32>}]} {
    %c0 = arith.constant 0 : index
    %c0_0 = arith.constant 0 : index
    %0 = vector.load %arg1[%c0, %c0_0] : memref<32x16xbf16, #tpu.memory_space<vmem>>, vector<32x16xbf16>
    %c0_1 = arith.constant 0 : index
    %c0_2 = arith.constant 0 : index
    %1 = vector.load %arg2[%c0_1, %c0_2] : memref<16x32xbf16, #tpu.memory_space<vmem>>, vector<16x32xbf16>
    %cst = arith.constant dense<0.000000e+00> : vector<32x32xf32>
    %2 = tpu.matmul %0, %1, %cst {dimension_numbers = #tpu.dot_dimension_numbers<[1], [0], [0], [1], [0, 0, 1, 1], [], []>} : vector<32x16xbf16>, vector<16x32xbf16>, vector<32x32xf32> -> vector<32x32xf32>
    %c0_3 = arith.constant 0 : index
    %c0_4 = arith.constant 0 : index
    %3 = vector.load %arg3[%c0_3, %c0_4] : memref<1x32xf32, #tpu.memory_space<vmem>>, vector<1x32xf32>
    %4 = vector.broadcast %3 : vector<1x32xf32> to vector<32x32xf32>
    %5 = arith.addf %2, %4 : vector<32x32xf32>
    %c0_5 = arith.constant 0 : index
    %c0_6 = arith.constant 0 : index
    %6 = vector.load %arg4[%c0_5, %c0_6] : memref<32x32xf32, #tpu.memory_space<vmem>>, vector<32x32xf32>
    tpu.vector_store %arg4[%c0_5, %c0_6], %5 {strides = array<i32>} : memref<32x32xf32, #tpu.memory_space<vmem>>, vector<32x32xf32>,
    return
  }
  func.func @transform_0(%arg0: i32) -> (i32, i32) {
    %c0_i32 = arith.constant 0 : i32
    %c0_i32_0 = arith.constant 0 : i32
    return %arg0, %c0_i32 : i32, i32
  }
  func.func @transform_1(%arg0: i32) -> (i32, i32) {
    %c0_i32 = arith.constant 0 : i32
    %c0_i32_0 = arith.constant 0 : i32
    %c0_i32_1 = arith.constant 0 : i32
    return %c0_i32, %c0_i32_0 : i32, i32
  }
  func.func @transform_2(%arg0: i32) -> (i32, i32) {
    %c0_i32 = arith.constant 0 : i32
    %c0_i32_0 = arith.constant 0 : i32
    %c0_i32_1 = arith.constant 0 : i32
    return %c0_i32, %c0_i32_0 : i32, i32
  }
  func.func @transform_3(%arg0: i32) -> (i32, i32) {
    %c0_i32 = arith.constant 0 : i32
    %c0_i32_0 = arith.constant 0 : i32
    return %arg0, %c0_i32 : i32, i32
  }
}

module attributes {stable_mosaic.version = 11 : i64} {
  func.func @_conv_mm_kernel(%arg0: i32, %arg1: memref<32x144xbf16, #tpu.memory_space<vmem>>, %arg2: memref<144x16xbf16, #tpu.memory_space<vmem>>, %arg3: memref<1x16xf32, #tpu.memory_space<vmem>>, %arg4: memref<32x16xf32, #tpu.memory_space<vmem>>) attributes {dimension_semantics = [#tpu.dimension_semantics<parallel>], iteration_bounds = array<i64: 1>, scalar_prefetch = 0 : i64, scratch_operands = 0 : i64, tpu.core_type = #tpu.core_type<tc>, window_params = [{transform_indices = @transform_0, window_bounds = array<i64: 32, 144>}, {pipeline_mode = #tpu.pipeline_mode<synchronous>, transform_indices = @transform_1, window_bounds = array<i64: 144, 16>}, {pipeline_mode = #tpu.pipeline_mode<synchronous>, transform_indices = @transform_2, window_bounds = array<i64: 1, 16>}, {transform_indices = @transform_3, window_bounds = array<i64: 32, 16>}]} {
    %c0 = arith.constant 0 : index
    %c0_0 = arith.constant 0 : index
    %0 = vector.load %arg1[%c0, %c0_0] : memref<32x144xbf16, #tpu.memory_space<vmem>>, vector<32x144xbf16>
    %c0_1 = arith.constant 0 : index
    %c0_2 = arith.constant 0 : index
    %1 = vector.load %arg2[%c0_1, %c0_2] : memref<144x16xbf16, #tpu.memory_space<vmem>>, vector<144x16xbf16>
    %cst = arith.constant dense<0.000000e+00> : vector<32x16xf32>
    %2 = tpu.matmul %0, %1, %cst {dimension_numbers = #tpu.dot_dimension_numbers<[1], [0], [0], [1], [0, 0, 1, 1], [], []>} : vector<32x144xbf16>, vector<144x16xbf16>, vector<32x16xf32> -> vector<32x16xf32>
    %c0_3 = arith.constant 0 : index
    %c0_4 = arith.constant 0 : index
    %3 = vector.load %arg3[%c0_3, %c0_4] : memref<1x16xf32, #tpu.memory_space<vmem>>, vector<1x16xf32>
    %4 = vector.broadcast %3 : vector<1x16xf32> to vector<32x16xf32>
    %5 = arith.addf %2, %4 : vector<32x16xf32>
    %cst_5 = arith.constant 0.000000e+00 : f32
    %6 = vector.broadcast %cst_5 : f32 to vector<32x16xf32>
    %7 = arith.maximumf %5, %6 : vector<32x16xf32>
    %c0_6 = arith.constant 0 : index
    %c0_7 = arith.constant 0 : index
    %8 = vector.load %arg4[%c0_6, %c0_7] : memref<32x16xf32, #tpu.memory_space<vmem>>, vector<32x16xf32>
    tpu.vector_store %arg4[%c0_6, %c0_7], %7 {strides = array<i32>} : memref<32x16xf32, #tpu.memory_space<vmem>>, vector<32x16xf32>,
    return
  }
  func.func @transform_0(%arg0: i32) -> (i32, i32) {
    %c0_i32 = arith.constant 0 : i32
    %c0_i32_0 = arith.constant 0 : i32
    return %arg0, %c0_i32 : i32, i32
  }
  func.func @transform_1(%arg0: i32) -> (i32, i32) {
    %c0_i32 = arith.constant 0 : i32
    %c0_i32_0 = arith.constant 0 : i32
    %c0_i32_1 = arith.constant 0 : i32
    return %c0_i32, %c0_i32_0 : i32, i32
  }
  func.func @transform_2(%arg0: i32) -> (i32, i32) {
    %c0_i32 = arith.constant 0 : i32
    %c0_i32_0 = arith.constant 0 : i32
    %c0_i32_1 = arith.constant 0 : i32
    return %c0_i32, %c0_i32_0 : i32, i32
  }
  func.func @transform_3(%arg0: i32) -> (i32, i32) {
    %c0_i32 = arith.constant 0 : i32
    %c0_i32_0 = arith.constant 0 : i32
    return %arg0, %c0_i32 : i32, i32
  }
}

module attributes {stable_mosaic.version = 11 : i64} {
  func.func @_se_residual_kernel(%arg0: i32, %arg1: memref<2x16x32xf32, #tpu.memory_space<vmem>>, %arg2: memref<32x8xf32, #tpu.memory_space<vmem>>, %arg3: memref<1x8xf32, #tpu.memory_space<vmem>>, %arg4: memref<8x32xf32, #tpu.memory_space<vmem>>, %arg5: memref<1x32xf32, #tpu.memory_space<vmem>>, %arg6: memref<2x16x32xf32, #tpu.memory_space<vmem>>, %arg7: memref<2x16x32xf32, #tpu.memory_space<vmem>>) attributes {dimension_semantics = [#tpu.dimension_semantics<arbitrary>], iteration_bounds = array<i64: 1>, scalar_prefetch = 0 : i64, scratch_operands = 0 : i64, tpu.core_type = #tpu.core_type<tc>, window_params = [{pipeline_mode = #tpu.pipeline_mode<synchronous>, transform_indices = @transform_0, window_bounds = array<i64: 2, 16, 32>}, {pipeline_mode = #tpu.pipeline_mode<synchronous>, transform_indices = @transform_1, window_bounds = array<i64: 32, 8>}, {pipeline_mode = #tpu.pipeline_mode<synchronous>, transform_indices = @transform_2, window_bounds = array<i64: 1, 8>}, {pipeline_mode = #tpu.pipeline_mode<synchronous>, transform_indices = @transform_3, window_bounds = array<i64: 8, 32>}, {pipeline_mode = #tpu.pipeline_mode<synchronous>, transform_indices = @transform_4, window_bounds = array<i64: 1, 32>}, {pipeline_mode = #tpu.pipeline_mode<synchronous>, transform_indices = @transform_5, window_bounds = array<i64: 2, 16, 32>}, {pipeline_mode = #tpu.pipeline_mode<synchronous>, transform_indices = @transform_6, window_bounds = array<i64: 2, 16, 32>}]} {
    %c0 = arith.constant 0 : index
    %c0_0 = arith.constant 0 : index
    %c0_1 = arith.constant 0 : index
    %0 = vector.load %arg1[%c0, %c0_0, %c0_1] : memref<2x16x32xf32, #tpu.memory_space<vmem>>, vector<2x16x32xf32>
    %cst = arith.constant dense<0.000000e+00> : vector<2x32xf32>
    %1 = vector.multi_reduction <add>, %0, %cst [1] : vector<2x16x32xf32> to vector<2x32xf32>
    %cst_2 = arith.constant 1.600000e+01 : f32
    %2 = vector.broadcast %cst_2 : f32 to vector<2x32xf32>
    %3 = arith.divf %1, %2 : vector<2x32xf32>
    %c0_3 = arith.constant 0 : index
    %c0_4 = arith.constant 0 : index
    %4 = vector.load %arg2[%c0_3, %c0_4] : memref<32x8xf32, #tpu.memory_space<vmem>>, vector<32x8xf32>
    %cst_5 = arith.constant dense<0.000000e+00> : vector<2x8xf32>
    %5 = tpu.matmul %3, %4, %cst_5 {dimension_numbers = #tpu.dot_dimension_numbers<[1], [0], [0], [1], [0, 0, 1, 1], [], []>} : vector<2x32xf32>, vector<32x8xf32>, vector<2x8xf32> -> vector<2x8xf32>
    %c0_6 = arith.constant 0 : index
    %c0_7 = arith.constant 0 : index
    %6 = vector.load %arg3[%c0_6, %c0_7] : memref<1x8xf32, #tpu.memory_space<vmem>>, vector<1x8xf32>
    %7 = vector.broadcast %6 : vector<1x8xf32> to vector<2x8xf32>
    %8 = arith.addf %5, %7 : vector<2x8xf32>
    %cst_8 = arith.constant 0.000000e+00 : f32
    %9 = vector.broadcast %cst_8 : f32 to vector<2x8xf32>
    %10 = arith.maximumf %8, %9 : vector<2x8xf32>
    %c0_9 = arith.constant 0 : index
    %c0_10 = arith.constant 0 : index
    %11 = vector.load %arg4[%c0_9, %c0_10] : memref<8x32xf32, #tpu.memory_space<vmem>>, vector<8x32xf32>
    %cst_11 = arith.constant dense<0.000000e+00> : vector<2x32xf32>
    %12 = tpu.matmul %10, %11, %cst_11 {dimension_numbers = #tpu.dot_dimension_numbers<[1], [0], [0], [1], [0, 0, 1, 1], [], []>} : vector<2x8xf32>, vector<8x32xf32>, vector<2x32xf32> -> vector<2x32xf32>
    %c0_12 = arith.constant 0 : index
    %c0_13 = arith.constant 0 : index
    %13 = vector.load %arg5[%c0_12, %c0_13] : memref<1x32xf32, #tpu.memory_space<vmem>>, vector<1x32xf32>
    %14 = vector.broadcast %13 : vector<1x32xf32> to vector<2x32xf32>
    %15 = arith.addf %12, %14 : vector<2x32xf32>
    %16 = arith.negf %15 : vector<2x32xf32>
    %17 = math.exp %16 : vector<2x32xf32>
    %cst_14 = arith.constant 1.000000e+00 : f32
    %18 = vector.broadcast %cst_14 : f32 to vector<2x32xf32>
    %19 = arith.addf %18, %17 : vector<2x32xf32>
    %20 = arith.divf %18, %19 : vector<2x32xf32>
    %21 = vector.shape_cast %20 : vector<2x32xf32> to vector<2x1x32xf32>
    %22 = vector.broadcast %21 : vector<2x1x32xf32> to vector<2x16x32xf32>
    %23 = arith.mulf %0, %22 : vector<2x16x32xf32>
    %c0_15 = arith.constant 0 : index
    %c0_16 = arith.constant 0 : index
    %c0_17 = arith.constant 0 : index
    %24 = vector.load %arg6[%c0_15, %c0_16, %c0_17] : memref<2x16x32xf32, #tpu.memory_space<vmem>>, vector<2x16x32xf32>
    %25 = arith.addf %23, %24 : vector<2x16x32xf32>
    %cst_18 = arith.constant 0.000000e+00 : f32
    %26 = vector.broadcast %cst_18 : f32 to vector<2x16x32xf32>
    %27 = arith.maximumf %25, %26 : vector<2x16x32xf32>
    %c0_19 = arith.constant 0 : index
    %c0_20 = arith.constant 0 : index
    %c0_21 = arith.constant 0 : index
    %28 = vector.load %arg7[%c0_19, %c0_20, %c0_21] : memref<2x16x32xf32, #tpu.memory_space<vmem>>, vector<2x16x32xf32>
    tpu.vector_store %arg7[%c0_19, %c0_20, %c0_21], %27 {strides = array<i32>} : memref<2x16x32xf32, #tpu.memory_space<vmem>>, vector<2x16x32xf32>,
    return
  }
  func.func @transform_0(%arg0: i32) -> (i32, i32, i32) {
    %c0_i32 = arith.constant 0 : i32
    %c0_i32_0 = arith.constant 0 : i32
    %c0_i32_1 = arith.constant 0 : i32
    %c0_i32_2 = arith.constant 0 : i32
    return %c0_i32, %c0_i32_0, %c0_i32_1 : i32, i32, i32
  }
  func.func @transform_1(%arg0: i32) -> (i32, i32) {
    %c0_i32 = arith.constant 0 : i32
    %c0_i32_0 = arith.constant 0 : i32
    %c0_i32_1 = arith.constant 0 : i32
    return %c0_i32, %c0_i32_0 : i32, i32
  }
  func.func @transform_2(%arg0: i32) -> (i32, i32) {
    %c0_i32 = arith.constant 0 : i32
    %c0_i32_0 = arith.constant 0 : i32
    %c0_i32_1 = arith.constant 0 : i32
    return %c0_i32, %c0_i32_0 : i32, i32
  }
  func.func @transform_3(%arg0: i32) -> (i32, i32) {
    %c0_i32 = arith.constant 0 : i32
    %c0_i32_0 = arith.constant 0 : i32
    %c0_i32_1 = arith.constant 0 : i32
    return %c0_i32, %c0_i32_0 : i32, i32
  }
  func.func @transform_4(%arg0: i32) -> (i32, i32) {
    %c0_i32 = arith.constant 0 : i32
    %c0_i32_0 = arith.constant 0 : i32
    %c0_i32_1 = arith.constant 0 : i32
    return %c0_i32, %c0_i32_0 : i32, i32
  }
  func.func @transform_5(%arg0: i32) -> (i32, i32, i32) {
    %c0_i32 = arith.constant 0 : i32
    %c0_i32_0 = arith.constant 0 : i32
    %c0_i32_1 = arith.constant 0 : i32
    %c0_i32_2 = arith.constant 0 : i32
    return %c0_i32, %c0_i32_0, %c0_i32_1 : i32, i32, i32
  }
  func.func @transform_6(%arg0: i32) -> (i32, i32, i32) {
    %c0_i32 = arith.constant 0 : i32
    %c0_i32_0 = arith.constant 0 : i32
    %c0_i32_1 = arith.constant 0 : i32
    %c0_i32_2 = arith.constant 0 : i32
    return %c0_i32, %c0_i32_0, %c0_i32_1 : i32, i32, i32
  }
}

module attributes {stable_mosaic.version = 11 : i64} {
  func.func @_conv_mm_kernel(%arg0: i32, %arg1: memref<8x32xbf16, #tpu.memory_space<vmem>>, %arg2: memref<32x64xbf16, #tpu.memory_space<vmem>>, %arg3: memref<1x64xf32, #tpu.memory_space<vmem>>, %arg4: memref<8x64xf32, #tpu.memory_space<vmem>>) attributes {dimension_semantics = [#tpu.dimension_semantics<parallel>], iteration_bounds = array<i64: 1>, scalar_prefetch = 0 : i64, scratch_operands = 0 : i64, tpu.core_type = #tpu.core_type<tc>, window_params = [{transform_indices = @transform_0, window_bounds = array<i64: 8, 32>}, {pipeline_mode = #tpu.pipeline_mode<synchronous>, transform_indices = @transform_1, window_bounds = array<i64: 32, 64>}, {pipeline_mode = #tpu.pipeline_mode<synchronous>, transform_indices = @transform_2, window_bounds = array<i64: 1, 64>}, {transform_indices = @transform_3, window_bounds = array<i64: 8, 64>}]} {
    %c0 = arith.constant 0 : index
    %c0_0 = arith.constant 0 : index
    %0 = vector.load %arg1[%c0, %c0_0] : memref<8x32xbf16, #tpu.memory_space<vmem>>, vector<8x32xbf16>
    %c0_1 = arith.constant 0 : index
    %c0_2 = arith.constant 0 : index
    %1 = vector.load %arg2[%c0_1, %c0_2] : memref<32x64xbf16, #tpu.memory_space<vmem>>, vector<32x64xbf16>
    %cst = arith.constant dense<0.000000e+00> : vector<8x64xf32>
    %2 = tpu.matmul %0, %1, %cst {dimension_numbers = #tpu.dot_dimension_numbers<[1], [0], [0], [1], [0, 0, 1, 1], [], []>} : vector<8x32xbf16>, vector<32x64xbf16>, vector<8x64xf32> -> vector<8x64xf32>
    %c0_3 = arith.constant 0 : index
    %c0_4 = arith.constant 0 : index
    %3 = vector.load %arg3[%c0_3, %c0_4] : memref<1x64xf32, #tpu.memory_space<vmem>>, vector<1x64xf32>
    %4 = vector.broadcast %3 : vector<1x64xf32> to vector<8x64xf32>
    %5 = arith.addf %2, %4 : vector<8x64xf32>
    %c0_5 = arith.constant 0 : index
    %c0_6 = arith.constant 0 : index
    %6 = vector.load %arg4[%c0_5, %c0_6] : memref<8x64xf32, #tpu.memory_space<vmem>>, vector<8x64xf32>
    tpu.vector_store %arg4[%c0_5, %c0_6], %5 {strides = array<i32>} : memref<8x64xf32, #tpu.memory_space<vmem>>, vector<8x64xf32>,
    return
  }
  func.func @transform_0(%arg0: i32) -> (i32, i32) {
    %c0_i32 = arith.constant 0 : i32
    %c0_i32_0 = arith.constant 0 : i32
    return %arg0, %c0_i32 : i32, i32
  }
  func.func @transform_1(%arg0: i32) -> (i32, i32) {
    %c0_i32 = arith.constant 0 : i32
    %c0_i32_0 = arith.constant 0 : i32
    %c0_i32_1 = arith.constant 0 : i32
    return %c0_i32, %c0_i32_0 : i32, i32
  }
  func.func @transform_2(%arg0: i32) -> (i32, i32) {
    %c0_i32 = arith.constant 0 : i32
    %c0_i32_0 = arith.constant 0 : i32
    %c0_i32_1 = arith.constant 0 : i32
    return %c0_i32, %c0_i32_0 : i32, i32
  }
  func.func @transform_3(%arg0: i32) -> (i32, i32) {
    %c0_i32 = arith.constant 0 : i32
    %c0_i32_0 = arith.constant 0 : i32
    return %arg0, %c0_i32 : i32, i32
  }
}

module attributes {stable_mosaic.version = 11 : i64} {
  func.func @_conv_mm_kernel(%arg0: i32, %arg1: memref<32x32xbf16, #tpu.memory_space<vmem>>, %arg2: memref<32x32xbf16, #tpu.memory_space<vmem>>, %arg3: memref<1x32xf32, #tpu.memory_space<vmem>>, %arg4: memref<32x32xf32, #tpu.memory_space<vmem>>) attributes {dimension_semantics = [#tpu.dimension_semantics<parallel>], iteration_bounds = array<i64: 1>, scalar_prefetch = 0 : i64, scratch_operands = 0 : i64, tpu.core_type = #tpu.core_type<tc>, window_params = [{transform_indices = @transform_0, window_bounds = array<i64: 32, 32>}, {pipeline_mode = #tpu.pipeline_mode<synchronous>, transform_indices = @transform_1, window_bounds = array<i64: 32, 32>}, {pipeline_mode = #tpu.pipeline_mode<synchronous>, transform_indices = @transform_2, window_bounds = array<i64: 1, 32>}, {transform_indices = @transform_3, window_bounds = array<i64: 32, 32>}]} {
    %c0 = arith.constant 0 : index
    %c0_0 = arith.constant 0 : index
    %0 = vector.load %arg1[%c0, %c0_0] : memref<32x32xbf16, #tpu.memory_space<vmem>>, vector<32x32xbf16>
    %c0_1 = arith.constant 0 : index
    %c0_2 = arith.constant 0 : index
    %1 = vector.load %arg2[%c0_1, %c0_2] : memref<32x32xbf16, #tpu.memory_space<vmem>>, vector<32x32xbf16>
    %cst = arith.constant dense<0.000000e+00> : vector<32x32xf32>
    %2 = tpu.matmul %0, %1, %cst {dimension_numbers = #tpu.dot_dimension_numbers<[1], [0], [0], [1], [0, 0, 1, 1], [], []>} : vector<32x32xbf16>, vector<32x32xbf16>, vector<32x32xf32> -> vector<32x32xf32>
    %c0_3 = arith.constant 0 : index
    %c0_4 = arith.constant 0 : index
    %3 = vector.load %arg3[%c0_3, %c0_4] : memref<1x32xf32, #tpu.memory_space<vmem>>, vector<1x32xf32>
    %4 = vector.broadcast %3 : vector<1x32xf32> to vector<32x32xf32>
    %5 = arith.addf %2, %4 : vector<32x32xf32>
    %cst_5 = arith.constant 0.000000e+00 : f32
    %6 = vector.broadcast %cst_5 : f32 to vector<32x32xf32>
    %7 = arith.maximumf %5, %6 : vector<32x32xf32>
    %c0_6 = arith.constant 0 : index
    %c0_7 = arith.constant 0 : index
    %8 = vector.load %arg4[%c0_6, %c0_7] : memref<32x32xf32, #tpu.memory_space<vmem>>, vector<32x32xf32>
    tpu.vector_store %arg4[%c0_6, %c0_7], %7 {strides = array<i32>} : memref<32x32xf32, #tpu.memory_space<vmem>>, vector<32x32xf32>,
    return
  }
  func.func @transform_0(%arg0: i32) -> (i32, i32) {
    %c0_i32 = arith.constant 0 : i32
    %c0_i32_0 = arith.constant 0 : i32
    return %arg0, %c0_i32 : i32, i32
  }
  func.func @transform_1(%arg0: i32) -> (i32, i32) {
    %c0_i32 = arith.constant 0 : i32
    %c0_i32_0 = arith.constant 0 : i32
    %c0_i32_1 = arith.constant 0 : i32
    return %c0_i32, %c0_i32_0 : i32, i32
  }
  func.func @transform_2(%arg0: i32) -> (i32, i32) {
    %c0_i32 = arith.constant 0 : i32
    %c0_i32_0 = arith.constant 0 : i32
    %c0_i32_1 = arith.constant 0 : i32
    return %c0_i32, %c0_i32_0 : i32, i32
  }
  func.func @transform_3(%arg0: i32) -> (i32, i32) {
    %c0_i32 = arith.constant 0 : i32
    %c0_i32_0 = arith.constant 0 : i32
    return %arg0, %c0_i32 : i32, i32
  }
}

module attributes {stable_mosaic.version = 11 : i64} {
  func.func @_conv_mm_kernel(%arg0: i32, %arg1: memref<8x288xbf16, #tpu.memory_space<vmem>>, %arg2: memref<288x32xbf16, #tpu.memory_space<vmem>>, %arg3: memref<1x32xf32, #tpu.memory_space<vmem>>, %arg4: memref<8x32xf32, #tpu.memory_space<vmem>>) attributes {dimension_semantics = [#tpu.dimension_semantics<parallel>], iteration_bounds = array<i64: 1>, scalar_prefetch = 0 : i64, scratch_operands = 0 : i64, tpu.core_type = #tpu.core_type<tc>, window_params = [{transform_indices = @transform_0, window_bounds = array<i64: 8, 288>}, {pipeline_mode = #tpu.pipeline_mode<synchronous>, transform_indices = @transform_1, window_bounds = array<i64: 288, 32>}, {pipeline_mode = #tpu.pipeline_mode<synchronous>, transform_indices = @transform_2, window_bounds = array<i64: 1, 32>}, {transform_indices = @transform_3, window_bounds = array<i64: 8, 32>}]} {
    %c0 = arith.constant 0 : index
    %c0_0 = arith.constant 0 : index
    %0 = vector.load %arg1[%c0, %c0_0] : memref<8x288xbf16, #tpu.memory_space<vmem>>, vector<8x288xbf16>
    %c0_1 = arith.constant 0 : index
    %c0_2 = arith.constant 0 : index
    %1 = vector.load %arg2[%c0_1, %c0_2] : memref<288x32xbf16, #tpu.memory_space<vmem>>, vector<288x32xbf16>
    %cst = arith.constant dense<0.000000e+00> : vector<8x32xf32>
    %2 = tpu.matmul %0, %1, %cst {dimension_numbers = #tpu.dot_dimension_numbers<[1], [0], [0], [1], [0, 0, 1, 1], [], []>} : vector<8x288xbf16>, vector<288x32xbf16>, vector<8x32xf32> -> vector<8x32xf32>
    %c0_3 = arith.constant 0 : index
    %c0_4 = arith.constant 0 : index
    %3 = vector.load %arg3[%c0_3, %c0_4] : memref<1x32xf32, #tpu.memory_space<vmem>>, vector<1x32xf32>
    %4 = vector.broadcast %3 : vector<1x32xf32> to vector<8x32xf32>
    %5 = arith.addf %2, %4 : vector<8x32xf32>
    %cst_5 = arith.constant 0.000000e+00 : f32
    %6 = vector.broadcast %cst_5 : f32 to vector<8x32xf32>
    %7 = arith.maximumf %5, %6 : vector<8x32xf32>
    %c0_6 = arith.constant 0 : index
    %c0_7 = arith.constant 0 : index
    %8 = vector.load %arg4[%c0_6, %c0_7] : memref<8x32xf32, #tpu.memory_space<vmem>>, vector<8x32xf32>
    tpu.vector_store %arg4[%c0_6, %c0_7], %7 {strides = array<i32>} : memref<8x32xf32, #tpu.memory_space<vmem>>, vector<8x32xf32>,
    return
  }
  func.func @transform_0(%arg0: i32) -> (i32, i32) {
    %c0_i32 = arith.constant 0 : i32
    %c0_i32_0 = arith.constant 0 : i32
    return %arg0, %c0_i32 : i32, i32
  }
  func.func @transform_1(%arg0: i32) -> (i32, i32) {
    %c0_i32 = arith.constant 0 : i32
    %c0_i32_0 = arith.constant 0 : i32
    %c0_i32_1 = arith.constant 0 : i32
    return %c0_i32, %c0_i32_0 : i32, i32
  }
  func.func @transform_2(%arg0: i32) -> (i32, i32) {
    %c0_i32 = arith.constant 0 : i32
    %c0_i32_0 = arith.constant 0 : i32
    %c0_i32_1 = arith.constant 0 : i32
    return %c0_i32, %c0_i32_0 : i32, i32
  }
  func.func @transform_3(%arg0: i32) -> (i32, i32) {
    %c0_i32 = arith.constant 0 : i32
    %c0_i32_0 = arith.constant 0 : i32
    return %arg0, %c0_i32 : i32, i32
  }
}

module attributes {stable_mosaic.version = 11 : i64} {
  func.func @_se_residual_kernel(%arg0: i32, %arg1: memref<2x4x64xf32, #tpu.memory_space<vmem>>, %arg2: memref<64x16xf32, #tpu.memory_space<vmem>>, %arg3: memref<1x16xf32, #tpu.memory_space<vmem>>, %arg4: memref<16x64xf32, #tpu.memory_space<vmem>>, %arg5: memref<1x64xf32, #tpu.memory_space<vmem>>, %arg6: memref<2x4x64xf32, #tpu.memory_space<vmem>>, %arg7: memref<2x4x64xf32, #tpu.memory_space<vmem>>) attributes {dimension_semantics = [#tpu.dimension_semantics<arbitrary>], iteration_bounds = array<i64: 1>, scalar_prefetch = 0 : i64, scratch_operands = 0 : i64, tpu.core_type = #tpu.core_type<tc>, window_params = [{pipeline_mode = #tpu.pipeline_mode<synchronous>, transform_indices = @transform_0, window_bounds = array<i64: 2, 4, 64>}, {pipeline_mode = #tpu.pipeline_mode<synchronous>, transform_indices = @transform_1, window_bounds = array<i64: 64, 16>}, {pipeline_mode = #tpu.pipeline_mode<synchronous>, transform_indices = @transform_2, window_bounds = array<i64: 1, 16>}, {pipeline_mode = #tpu.pipeline_mode<synchronous>, transform_indices = @transform_3, window_bounds = array<i64: 16, 64>}, {pipeline_mode = #tpu.pipeline_mode<synchronous>, transform_indices = @transform_4, window_bounds = array<i64: 1, 64>}, {pipeline_mode = #tpu.pipeline_mode<synchronous>, transform_indices = @transform_5, window_bounds = array<i64: 2, 4, 64>}, {pipeline_mode = #tpu.pipeline_mode<synchronous>, transform_indices = @transform_6, window_bounds = array<i64: 2, 4, 64>}]} {
    %c0 = arith.constant 0 : index
    %c0_0 = arith.constant 0 : index
    %c0_1 = arith.constant 0 : index
    %0 = vector.load %arg1[%c0, %c0_0, %c0_1] : memref<2x4x64xf32, #tpu.memory_space<vmem>>, vector<2x4x64xf32>
    %cst = arith.constant dense<0.000000e+00> : vector<2x64xf32>
    %1 = vector.multi_reduction <add>, %0, %cst [1] : vector<2x4x64xf32> to vector<2x64xf32>
    %cst_2 = arith.constant 4.000000e+00 : f32
    %2 = vector.broadcast %cst_2 : f32 to vector<2x64xf32>
    %3 = arith.divf %1, %2 : vector<2x64xf32>
    %c0_3 = arith.constant 0 : index
    %c0_4 = arith.constant 0 : index
    %4 = vector.load %arg2[%c0_3, %c0_4] : memref<64x16xf32, #tpu.memory_space<vmem>>, vector<64x16xf32>
    %cst_5 = arith.constant dense<0.000000e+00> : vector<2x16xf32>
    %5 = tpu.matmul %3, %4, %cst_5 {dimension_numbers = #tpu.dot_dimension_numbers<[1], [0], [0], [1], [0, 0, 1, 1], [], []>} : vector<2x64xf32>, vector<64x16xf32>, vector<2x16xf32> -> vector<2x16xf32>
    %c0_6 = arith.constant 0 : index
    %c0_7 = arith.constant 0 : index
    %6 = vector.load %arg3[%c0_6, %c0_7] : memref<1x16xf32, #tpu.memory_space<vmem>>, vector<1x16xf32>
    %7 = vector.broadcast %6 : vector<1x16xf32> to vector<2x16xf32>
    %8 = arith.addf %5, %7 : vector<2x16xf32>
    %cst_8 = arith.constant 0.000000e+00 : f32
    %9 = vector.broadcast %cst_8 : f32 to vector<2x16xf32>
    %10 = arith.maximumf %8, %9 : vector<2x16xf32>
    %c0_9 = arith.constant 0 : index
    %c0_10 = arith.constant 0 : index
    %11 = vector.load %arg4[%c0_9, %c0_10] : memref<16x64xf32, #tpu.memory_space<vmem>>, vector<16x64xf32>
    %cst_11 = arith.constant dense<0.000000e+00> : vector<2x64xf32>
    %12 = tpu.matmul %10, %11, %cst_11 {dimension_numbers = #tpu.dot_dimension_numbers<[1], [0], [0], [1], [0, 0, 1, 1], [], []>} : vector<2x16xf32>, vector<16x64xf32>, vector<2x64xf32> -> vector<2x64xf32>
    %c0_12 = arith.constant 0 : index
    %c0_13 = arith.constant 0 : index
    %13 = vector.load %arg5[%c0_12, %c0_13] : memref<1x64xf32, #tpu.memory_space<vmem>>, vector<1x64xf32>
    %14 = vector.broadcast %13 : vector<1x64xf32> to vector<2x64xf32>
    %15 = arith.addf %12, %14 : vector<2x64xf32>
    %16 = arith.negf %15 : vector<2x64xf32>
    %17 = math.exp %16 : vector<2x64xf32>
    %cst_14 = arith.constant 1.000000e+00 : f32
    %18 = vector.broadcast %cst_14 : f32 to vector<2x64xf32>
    %19 = arith.addf %18, %17 : vector<2x64xf32>
    %20 = arith.divf %18, %19 : vector<2x64xf32>
    %21 = vector.shape_cast %20 : vector<2x64xf32> to vector<2x1x64xf32>
    %22 = vector.broadcast %21 : vector<2x1x64xf32> to vector<2x4x64xf32>
    %23 = arith.mulf %0, %22 : vector<2x4x64xf32>
    %c0_15 = arith.constant 0 : index
    %c0_16 = arith.constant 0 : index
    %c0_17 = arith.constant 0 : index
    %24 = vector.load %arg6[%c0_15, %c0_16, %c0_17] : memref<2x4x64xf32, #tpu.memory_space<vmem>>, vector<2x4x64xf32>
    %25 = arith.addf %23, %24 : vector<2x4x64xf32>
    %cst_18 = arith.constant 0.000000e+00 : f32
    %26 = vector.broadcast %cst_18 : f32 to vector<2x4x64xf32>
    %27 = arith.maximumf %25, %26 : vector<2x4x64xf32>
    %c0_19 = arith.constant 0 : index
    %c0_20 = arith.constant 0 : index
    %c0_21 = arith.constant 0 : index
    %28 = vector.load %arg7[%c0_19, %c0_20, %c0_21] : memref<2x4x64xf32, #tpu.memory_space<vmem>>, vector<2x4x64xf32>
    tpu.vector_store %arg7[%c0_19, %c0_20, %c0_21], %27 {strides = array<i32>} : memref<2x4x64xf32, #tpu.memory_space<vmem>>, vector<2x4x64xf32>,
    return
  }
  func.func @transform_0(%arg0: i32) -> (i32, i32, i32) {
    %c0_i32 = arith.constant 0 : i32
    %c0_i32_0 = arith.constant 0 : i32
    %c0_i32_1 = arith.constant 0 : i32
    %c0_i32_2 = arith.constant 0 : i32
    return %c0_i32, %c0_i32_0, %c0_i32_1 : i32, i32, i32
  }
  func.func @transform_1(%arg0: i32) -> (i32, i32) {
    %c0_i32 = arith.constant 0 : i32
    %c0_i32_0 = arith.constant 0 : i32
    %c0_i32_1 = arith.constant 0 : i32
    return %c0_i32, %c0_i32_0 : i32, i32
  }
  func.func @transform_2(%arg0: i32) -> (i32, i32) {
    %c0_i32 = arith.constant 0 : i32
    %c0_i32_0 = arith.constant 0 : i32
    %c0_i32_1 = arith.constant 0 : i32
    return %c0_i32, %c0_i32_0 : i32, i32
  }
  func.func @transform_3(%arg0: i32) -> (i32, i32) {
    %c0_i32 = arith.constant 0 : i32
    %c0_i32_0 = arith.constant 0 : i32
    %c0_i32_1 = arith.constant 0 : i32
    return %c0_i32, %c0_i32_0 : i32, i32
  }
  func.func @transform_4(%arg0: i32) -> (i32, i32) {
    %c0_i32 = arith.constant 0 : i32
    %c0_i32_0 = arith.constant 0 : i32
    %c0_i32_1 = arith.constant 0 : i32
    return %c0_i32, %c0_i32_0 : i32, i32
  }
  func.func @transform_5(%arg0: i32) -> (i32, i32, i32) {
    %c0_i32 = arith.constant 0 : i32
    %c0_i32_0 = arith.constant 0 : i32
    %c0_i32_1 = arith.constant 0 : i32
    %c0_i32_2 = arith.constant 0 : i32
    return %c0_i32, %c0_i32_0, %c0_i32_1 : i32, i32, i32
  }
  func.func @transform_6(%arg0: i32) -> (i32, i32, i32) {
    %c0_i32 = arith.constant 0 : i32
    %c0_i32_0 = arith.constant 0 : i32
    %c0_i32_1 = arith.constant 0 : i32
    %c0_i32_2 = arith.constant 0 : i32
    return %c0_i32, %c0_i32_0, %c0_i32_1 : i32, i32, i32
  }
}

module attributes {stable_mosaic.version = 11 : i64} {
  func.func @_heads_kernel(%arg0: i32, %arg1: memref<2x4x64xf32, #tpu.memory_space<vmem>>, %arg2: memref<64x256xf32, #tpu.memory_space<vmem>>, %arg3: memref<1x256xf32, #tpu.memory_space<vmem>>, %arg4: memref<2x256xf32, #tpu.memory_space<vmem>>) attributes {dimension_semantics = [#tpu.dimension_semantics<arbitrary>], iteration_bounds = array<i64: 1>, scalar_prefetch = 0 : i64, scratch_operands = 0 : i64, tpu.core_type = #tpu.core_type<tc>, window_params = [{pipeline_mode = #tpu.pipeline_mode<synchronous>, transform_indices = @transform_0, window_bounds = array<i64: 2, 4, 64>}, {pipeline_mode = #tpu.pipeline_mode<synchronous>, transform_indices = @transform_1, window_bounds = array<i64: 64, 256>}, {pipeline_mode = #tpu.pipeline_mode<synchronous>, transform_indices = @transform_2, window_bounds = array<i64: 1, 256>}, {pipeline_mode = #tpu.pipeline_mode<synchronous>, transform_indices = @transform_3, window_bounds = array<i64: 2, 256>}]} {
    %c0 = arith.constant 0 : index
    %c0_0 = arith.constant 0 : index
    %c0_1 = arith.constant 0 : index
    %0 = vector.load %arg1[%c0, %c0_0, %c0_1] : memref<2x4x64xf32, #tpu.memory_space<vmem>>, vector<2x4x64xf32>
    %cst = arith.constant dense<0.000000e+00> : vector<2x64xf32>
    %1 = vector.multi_reduction <add>, %0, %cst [1] : vector<2x4x64xf32> to vector<2x64xf32>
    %cst_2 = arith.constant 4.000000e+00 : f32
    %2 = vector.broadcast %cst_2 : f32 to vector<2x64xf32>
    %3 = arith.divf %1, %2 : vector<2x64xf32>
    %c0_3 = arith.constant 0 : index
    %c0_4 = arith.constant 0 : index
    %4 = vector.load %arg2[%c0_3, %c0_4] : memref<64x256xf32, #tpu.memory_space<vmem>>, vector<64x256xf32>
    %cst_5 = arith.constant dense<0.000000e+00> : vector<2x256xf32>
    %5 = tpu.matmul %3, %4, %cst_5 {dimension_numbers = #tpu.dot_dimension_numbers<[1], [0], [0], [1], [0, 0, 1, 1], [], []>} : vector<2x64xf32>, vector<64x256xf32>, vector<2x256xf32> -> vector<2x256xf32>
    %c0_6 = arith.constant 0 : index
    %c0_7 = arith.constant 0 : index
    %6 = vector.load %arg3[%c0_6, %c0_7] : memref<1x256xf32, #tpu.memory_space<vmem>>, vector<1x256xf32>
    %7 = vector.broadcast %6 : vector<1x256xf32> to vector<2x256xf32>
    %8 = arith.addf %5, %7 : vector<2x256xf32>
    %c0_8 = arith.constant 0 : index
    %c0_9 = arith.constant 0 : index
    %9 = vector.load %arg4[%c0_8, %c0_9] : memref<2x256xf32, #tpu.memory_space<vmem>>, vector<2x256xf32>
    tpu.vector_store %arg4[%c0_8, %c0_9], %8 {strides = array<i32>} : memref<2x256xf32, #tpu.memory_space<vmem>>, vector<2x256xf32>,
    return
  }
  func.func @transform_0(%arg0: i32) -> (i32, i32, i32) {
    %c0_i32 = arith.constant 0 : i32
    %c0_i32_0 = arith.constant 0 : i32
    %c0_i32_1 = arith.constant 0 : i32
    %c0_i32_2 = arith.constant 0 : i32
    return %c0_i32, %c0_i32_0, %c0_i32_1 : i32, i32, i32
  }
  func.func @transform_1(%arg0: i32) -> (i32, i32) {
    %c0_i32 = arith.constant 0 : i32
    %c0_i32_0 = arith.constant 0 : i32
    %c0_i32_1 = arith.constant 0 : i32
    return %c0_i32, %c0_i32_0 : i32, i32
  }
  func.func @transform_2(%arg0: i32) -> (i32, i32) {
    %c0_i32 = arith.constant 0 : i32
    %c0_i32_0 = arith.constant 0 : i32
    %c0_i32_1 = arith.constant 0 : i32
    return %c0_i32, %c0_i32_0 : i32, i32
  }
  func.func @transform_3(%arg0: i32) -> (i32, i32) {
    %c0_i32 = arith.constant 0 : i32
    %c0_i32_0 = arith.constant 0 : i32
    %c0_i32_1 = arith.constant 0 : i32
    return %c0_i32, %c0_i32_0 : i32, i32
  }
}

</mosaic_0001>

<bundles_post_ra>
// kernel: seresnext_forward.13
= control target key start
LH: loop header
LB: loop body
LE: loop exit
PB: predicated region body
PF: predicated region fallthrough
CT: control target
= control target key end

     0   :  { %vm131_vm0 = vcmask 1040384   ;;  %vm106_vm1 = vcmask 400384   ;;  %v349_v5 = vmov 0   ;;  %vm250_vm2 = vcmask 130048   ;;  %s481_s1 = inlined_call_operand.vmem [shape: bf16[49,16], index: 1, kind: input, shape index: {}]   ;;  %s482_s0 = inlined_call_operand.vmem [shape: bf16[128,49], index: 0, kind: input, shape index: {}]   ;;  %s483_s2 = inlined_call_operand.vmem [shape: f32[1,16], index: 2, kind: input, shape index: {}]   ;;  %s484_s3 = inlined_call_operand.vmem [shape: f32[128,16], index: 3, kind: output, shape index: {}]  }
   0x1   :  { %v337_v0 = vld [vmem:[%s481_s1] sm:$0xff]   ;;  %v338_v1 = vld [vmem:[%s481_s1 + $0x8] sm:$0xff]   ;;  %v339_v2 = vld [vmem:[%s481_s1 + $0x10] sm:$0xff]   ;;  %v133_v6 = vsel %vm131_vm0, 65535, %v349_v5 }
   0x2   :  { %304 = vmatprep.subr.bf16.mxu0 %v337_v0  ;;  %328 = vmatprep.subr.bf16.mxu1 %v337_v0  ;;  %v340_v3 = vld [vmem:[%s481_s1 + $0x18] ss:$0 sps:$4 sm:$0x11]   ;;  %v341_v4 = vld [vmem:[%s482_s0] sm:$0xff]   ;;  %v343_v9 = vld [vmem:[%s482_s0 + $0x8] sm:$0xff]  }
   0x3   :  { %305 = vmatpush3.bf16.msra.mxu0 %v337_v0  ;;  %332 = vmatpush3.bf16.msra.mxu1 %v337_v0  ;;  %v342_v7 = vld [vmem:[%s482_s0 + $0x20] sm:$0xff]   ;;  %v135_v8 = vand.u32 %v340_v3, %v133_v6  ;;  %v344_v10 = vld [vmem:[%s482_s0 + $0x28] sm:$0xff]   ;;  %v345_v11 = vld [vmem:[%s482_s0 + $0x10] sm:$0xff]  }
   0x4   :  { %306 = vmatprep.subr.bf16.mxu0 %v338_v1  ;;  %329 = vmatprep.subr.bf16.mxu1 %v338_v1  ;;  %v346_v12 = vld [vmem:[%s482_s0 + $0x30] sm:$0xff]   ;;  %v347_v13 = vld [vmem:[%s482_s0 + $0x18] sm:$0xff]   ;;  %v271_v15 = vld [vmem:[%s483_s2] ss:$0 sm:$0xff] }
   0x5   :  { %312 = vmatprep.mubr.msk.bf16.mxu0 %vm106_vm1, %v341_v4  ;;  %320 = vmatprep.mubr.msk.bf16.mxu1 %vm106_vm1, %v342_v7  ;;  %v348_v14 = vld [vmem:[%s482_s0 + $0x38] sm:$0xff]  }
   0x7   :  { %307 = vmatpush3.bf16.msra.mxu0 %v338_v1  ;;  %333 = vmatpush3.bf16.msra.mxu1 %v338_v1 }
   0x8   :  { %308 = vmatprep.subr.bf16.mxu0 %v339_v2  ;;  %330 = vmatprep.subr.bf16.mxu1 %v339_v2 }
   0xb   :  { %309 = vmatpush3.bf16.msra.mxu0 %v339_v2  ;;  %334 = vmatpush3.bf16.msra.mxu1 %v339_v2 }
   0xc   :  { %310 = vmatprep.subr.bf16.mxu0 %v135_v8  ;;  %331 = vmatprep.subr.bf16.mxu1 %v135_v8 }
   0xf   :  { %311 = vmatpush3.bf16.msra.mxu0 %v135_v8  ;;  %335 = vmatpush3.bf16.msra.mxu1 %v135_v8 }
  0x12   :  { %313 = vmatmul.mubr.msk.bf16.vlgmr.msra.gmra.mrb[0].mxu0 %vm106_vm1, %v343_v9  ;;  %321 = vmatmul.mubr.msk.bf16.vlgmr.msra.gmra.mrb[0].mxu1 %vm106_vm1, %v344_v10 }
  0x13   :  { %316 = vmatprep.mubr.msk.bf16.mxu0 %vm106_vm1, %v345_v11  ;;  %324 = vmatprep.mubr.msk.bf16.mxu1 %vm106_vm1, %v346_v12 }
  0x1a   :  { %317 = vmatmul.mubr.msk.bf16.gmra.mrb[4].mxu0 %vm106_vm1, %v347_v13  ;;  %325 = vmatmul.mubr.msk.bf16.gmra.mrb[4].mxu1 %vm106_vm1, %v348_v14 }
  0xe5   :  { %v314_v16 = vpop.f32.mrb[0].mxu0  ;;  %v322_v17 = vpop.f32.mrb[0].mxu1 }
  0xe6   :  { %v180_v18 = vadd.f32 %v314_v16, %v271_v15  ;;  %v212_v19 = vadd.f32 %v322_v17, %v271_v15  ;;  %v171_v20 = vpop.f32.mrb[1].mxu0  ;;  %v203_v21 = vpop.f32.mrb[1].mxu1 }
  0xe7   :  { %v172_v22 = vadd.f32 %v271_v15, %v171_v20  ;;  %v204_v23 = vadd.f32 %v271_v15, %v203_v21  ;;  %v315_v24 = vpop.f32.mrb[2].mxu0  ;;  %v323_v25 = vpop.f32.mrb[2].mxu1 }
  0xe8   :  { %v236_v26 = vmax.f32 %v180_v18, 0.0  ;;  %v244_v27 = vmax.f32 %v212_v19, 0.0  ;;  %v183_v28 = vadd.f32 %v315_v24, %v271_v15  ;;  %v215_v29 = vadd.f32 %v323_v25, %v271_v15  ;;  %v174_v30 = vpop.f32.mrb[3].mxu0  ;;  %v206_v31 = vpop.f32.mrb[3].mxu1 }
  0xe9   :  { %v234_v32 = vmax.f32 %v172_v22, 0.0  ;;  %v242_v33 = vmax.f32 %v204_v23, 0.0  ;;  %v175_v34 = vadd.f32 %v271_v15, %v174_v30  ;;  %v207_v35 = vadd.f32 %v271_v15, %v206_v31 }
  0xea   :  { %253 = vst.msk [vmem:[%s484_s3 + $0x10] sm:$0xff] %vm250_vm2, %v236_v26  ;;  %261 = vst.msk [vmem:[%s484_s3 + $0x50] sm:$0xff] %vm250_vm2, %v244_v27  ;;  %v237_v36 = vmax.f32 %v183_v28, 0.0  ;;  %v245_v37 = vmax.f32 %v215_v29, 0.0 }
  0xeb   :  { %251 = vst.msk [vmem:[%s484_s3] sm:$0xff] %vm250_vm2, %v234_v32  ;;  %259 = vst.msk [vmem:[%s484_s3 + $0x40] sm:$0xff] %vm250_vm2, %v242_v33  ;;  %v235_v38 = vmax.f32 %v175_v34, 0.0  ;;  %v243_v39 = vmax.f32 %v207_v35, 0.0 }
  0xec   :  { %254 = vst.msk [vmem:[%s484_s3 + $0x18] sm:$0xff] %vm250_vm2, %v237_v36  ;;  %262 = vst.msk [vmem:[%s484_s3 + $0x58] sm:$0xff] %vm250_vm2, %v245_v37 }
  0xed   :  { %252 = vst.msk [vmem:[%s484_s3 + $0x8] sm:$0xff] %vm250_vm2, %v235_v38  ;;  %260 = vst.msk [vmem:[%s484_s3 + $0x48] sm:$0xff] %vm250_vm2, %v243_v39  ;;  %v318_v40 = vpop.f32.mrb[4].mxu0  ;;  %v326_v41 = vpop.f32.mrb[4].mxu1 }
  0xee   :  { %v196_v42 = vadd.f32 %v318_v40, %v271_v15  ;;  %v228_v43 = vadd.f32 %v326_v41, %v271_v15  ;;  %v187_v44 = vpop.f32.mrb[5].mxu0  ;;  %v219_v45 = vpop.f32.mrb[5].mxu1 }
  0xef   :  { %v188_v46 = vadd.f32 %v271_v15, %v187_v44  ;;  %v220_v47 = vadd.f32 %v271_v15, %v219_v45  ;;  %v319_v48 = vpop.f32.mrb[6].mxu0  ;;  %v327_v49 = vpop.f32.mrb[6].mxu1 }
  0xf0   :  { %v240_v50 = vmax.f32 %v196_v42, 0.0  ;;  %v248_v51 = vmax.f32 %v228_v43, 0.0  ;;  %v199_v52 = vadd.f32 %v319_v48, %v271_v15  ;;  %v231_v53 = vadd.f32 %v327_v49, %v271_v15  ;;  %v190_v54 = vpop.f32.mrb[7].mxu0  ;;  %v222_v55 = vpop.f32.mrb[7].mxu1 }
  0xf1   :  { %v238_v56 = vmax.f32 %v188_v46, 0.0  ;;  %v246_v57 = vmax.f32 %v220_v47, 0.0  ;;  %v191_v58 = vadd.f32 %v271_v15, %v190_v54  ;;  %v223_v59 = vadd.f32 %v271_v15, %v222_v55 }
  0xf2   :  { %257 = vst.msk [vmem:[%s484_s3 + $0x30] sm:$0xff] %vm250_vm2, %v240_v50  ;;  %265 = vst.msk [vmem:[%s484_s3 + $0x70] sm:$0xff] %vm250_vm2, %v248_v51  ;;  %v241_v60 = vmax.f32 %v199_v52, 0.0  ;;  %v249_v61 = vmax.f32 %v231_v53, 0.0 }
  0xf3   :  { %255 = vst.msk [vmem:[%s484_s3 + $0x20] sm:$0xff] %vm250_vm2, %v238_v56  ;;  %263 = vst.msk [vmem:[%s484_s3 + $0x60] sm:$0xff] %vm250_vm2, %v246_v57  ;;  %v239_v62 = vmax.f32 %v191_v58, 0.0  ;;  %v247_v63 = vmax.f32 %v223_v59, 0.0 }
  0xf4   :  { %258 = vst.msk [vmem:[%s484_s3 + $0x38] sm:$0xff] %vm250_vm2, %v241_v60  ;;  %266 = vst.msk [vmem:[%s484_s3 + $0x78] sm:$0xff] %vm250_vm2, %v249_v61 }
  0xf5   :  { %256 = vst.msk [vmem:[%s484_s3 + $0x28] sm:$0xff] %vm250_vm2, %v239_v62  ;;  %264 = vst.msk [vmem:[%s484_s3 + $0x68] sm:$0xff] %vm250_vm2, %v247_v63 }

// kernel: seresnext_forward.14
= control target key start
LH: loop header
LB: loop body
LE: loop exit
PB: predicated region body
PF: predicated region fallthrough
CT: control target
= control target key end

     0   :  { %vm72_vm0 = vcmask 130048   ;;  %vm74_vm1 = vcmask 122880   ;;  %vm394_vm2 = vcmask 1041409   ;;  %vm396_vm3 = vcmask 1042434   ;;  %s817_s0 = inlined_call_operand.vmem [shape: f32[32,9,16], index: 0, kind: input, shape index: {}]   ;;  %s818_s1 = inlined_call_operand.vmem [shape: f32[32,16], index: 1, kind: output, shape index: {}]  }
   0x1   :  { %v8_v0 = vld [vmem:[%s817_s0] sm:$0xff]  ;;  %v9_v1 = vld [vmem:[%s817_s0 + $0x8] sm:$0x1]  ;;  %v10_v2 = vld [vmem:[%s817_s0 + $0x10] sm:$0xff]  ;;  %vm398_vm4 = vcmask 1043459   ;;  %vm400_vm5 = vcmask 1044484  }
   0x2   :  { %v11_v3 = vld [vmem:[%s817_s0 + $0x18] sm:$0x1]  ;;  %v12_v4 = vld [vmem:[%s817_s0 + $0x20] sm:$0xff]  ;;  %v13_v5 = vld [vmem:[%s817_s0 + $0x28] sm:$0x1]  ;;  %v73_v6 = vsel %vm72_vm0, %v8_v0, -inf }
   0x3   :  { %v75_v7 = vsel %vm74_vm1, %v9_v1, -inf  ;;  %v83_v8 = vsel %vm72_vm0, %v10_v2, -inf  ;;  %v14_v9 = vld [vmem:[%s817_s0 + $0x30] sm:$0xff]  ;;  %v84_v11 = vsel %vm74_vm1, %v11_v3, -inf  ;;  %v92_v13 = vsel %vm72_vm0, %v12_v4, -inf  ;;  %v16_v16 = vld [vmem:[%s817_s0 + $0x40] sm:$0xff] }
   0x4   :  { %v76_v10 = vmax.f32 %v73_v6, %v75_v7  ;;  %v85_v12 = vmax.f32 %v83_v8, %v84_v11  ;;  %v93_v14 = vsel %vm74_vm1, %v13_v5, -inf  ;;  %v15_v15 = vld [vmem:[%s817_s0 + $0x38] sm:$0x1]  ;;  %v101_v20 = vsel %vm72_vm0, %v14_v9, -inf  ;;  %v17_v21 = vld [vmem:[%s817_s0 + $0x48] sm:$0x1] }
   0x5   :  { %v94_v18 = vmax.f32 %v92_v13, %v93_v14  ;;  %v102_v25 = vsel %vm74_vm1, %v15_v15, -inf  ;;  %v110_v26 = vsel %vm72_vm0, %v16_v16, -inf  ;;  %v111_v31 = vsel %vm74_vm1, %v17_v21, -inf  ;;  %v18_v32 = vld [vmem:[%s817_s0 + $0x50] sm:$0xff]  ;;  %v19_v38 = vld [vmem:[%s817_s0 + $0x58] sm:$0x1] }
   0x6   :  { %v77_v17 = vrot.slane %v76_v10, 4  ;;  %v86_v19 = vrot.slane %v85_v12, 4  ;;  %v103_v29 = vmax.f32 %v101_v20, %v102_v25  ;;  %v112_v35 = vmax.f32 %v110_v26, %v111_v31  ;;  %v20_v41 = vld [vmem:[%s817_s0 + $0x60] sm:$0xff]  ;;  %v21_v46 = vld [vmem:[%s817_s0 + $0x68] sm:$0x1]  ;;  %v22_v53 = vld [vmem:[%s817_s0 + $0x70] sm:$0xff] }
   0x7   :  { %v95_v23 = vrot.slane %v94_v18, 4  ;;  %v119_v45 = vsel %vm72_vm0, %v18_v32, -inf  ;;  %v120_v52 = vsel %vm74_vm1, %v19_v38, -inf  ;;  %v128_v56 = vsel %vm72_vm0, %v20_v41, -inf  ;;  %v23_v57 = vld [vmem:[%s817_s0 + $0x78] sm:$0x1] }
   0x8   :  { %v78_v22 = vmax.f32 %v76_v10, %v77_v17  ;;  %v87_v24 = vmax.f32 %v85_v12, %v86_v19  ;;  %v104_v37 = vrot.slane %v103_v29, 4  ;;  %v113_v44 = vrot.slane %v112_v35, 4  ;;  %v24_v58 = vld [vmem:[%s817_s0 + $0x80] sm:$0xff]  ;;  %v25_v63 = vld [vmem:[%s817_s0 + $0x88] sm:$0x1]  ;;  %v26_v2 = vld [vmem:[%s817_s0 + $0x90] sm:$0xff] }
   0x9   :  { %v96_v28 = vmax.f32 %v94_v18, %v95_v23  ;;  %v121_v55 = vmax.f32 %v119_v45, %v120_v52  ;;  %v129_v61 = vsel %vm74_vm1, %v21_v46, -inf  ;;  %v137_v5 = vsel %vm72_vm0, %v22_v53, -inf  ;;  %v27_v7 = vld [vmem:[%s817_s0 + $0x98] sm:$0x1]  ;;  %v28_v8 = vld [vmem:[%s817_s0 + $0xa0] sm:$0xff]  ;;  %v30_v18 = vld [vmem:[%s817_s0 + $0xb0] sm:$0xff] }
   0xa   :  { %v79_v27 = vrot.slane %v78_v22, 2  ;;  %v88_v30 = vrot.slane %v87_v24, 2  ;;  %v105_v43 = vmax.f32 %v103_v29, %v104_v37  ;;  %v114_v51 = vmax.f32 %v112_v35, %v113_v44  ;;  %v29_v13 = vld [vmem:[%s817_s0 + $0xa8] sm:$0x1]  ;;  %v31_v19 = vld [vmem:[%s817_s0 + $0xb8] sm:$0x1] }
   0xb   :  { %v97_v34 = vrot.slane %v96_v28, 2  ;;  %v122_v0 = vrot.slane %v121_v55, 4  ;;  %v130_v1 = vmax.f32 %v128_v56, %v129_v61  ;;  %v138_v11 = vsel %vm74_vm1, %v23_v57, -inf  ;;  %v33_v37 = vld [vmem:[%s817_s0 + $0xc8] sm:$0x1]  ;;  %v34_v46 = vld [vmem:[%s817_s0 + $0xd0] sm:$0xff] }
   0xc   :  { %v80_v33 = vmax.f32 %v78_v22, %v79_v27  ;;  %v89_v36 = vmax.f32 %v87_v24, %v88_v30  ;;  %v106_v50 = vrot.slane %v105_v43, 2  ;;  %v115_v60 = vrot.slane %v114_v51, 2 }
   0xd   :  { %v98_v40 = vmax.f32 %v96_v28, %v97_v34  ;;  %v123_v9 = vmax.f32 %v121_v55, %v122_v0  ;;  %v131_v10 = vrot.slane %v130_v1, 4  ;;  %v146_v12 = vsel %vm72_vm0, %v24_v58, -inf  ;;  %v32_v28 = vld [vmem:[%s817_s0 + $0xc0] sm:$0xff] }
   0xe   :  { %v81_v39 = vrot.slane %v80_v33, 1  ;;  %v90_v42 = vrot.slane %v89_v36, 1  ;;  %v107_v59 = vmax.f32 %v105_v43, %v106_v50  ;;  %v116_v4 = vmax.f32 %v114_v51, %v115_v60  ;;  %v35_v51 = vld [vmem:[%s817_s0 + $0xd8] sm:$0x1]  ;;  %v36_v60 = vld [vmem:[%s817_s0 + $0xe0] sm:$0xff] }
   0xf   :  { %v99_v48 = vrot.slane %v98_v40, 1  ;;  %v139_v16 = vmax.f32 %v137_v5, %v138_v11  ;;  %v147_v17 = vsel %vm74_vm1, %v25_v63, -inf  ;;  %v124_v20 = vrot.slane %v123_v9, 2 }
  0x10   :  { %v82_v47 = vmax.f32 %v80_v33, %v81_v39  ;;  %v91_v49 = vmax.f32 %v89_v36, %v90_v42  ;;  %v108_v3 = vrot.slane %v107_v59, 1  ;;  %v117_v15 = vrot.slane %v116_v4, 1 }
  0x11   :  { %v100_v54 = vmax.f32 %v98_v40, %v99_v48  ;;  %v132_v21 = vmax.f32 %v130_v1, %v131_v10  ;;  %v148_v22 = vmax.f32 %v146_v12, %v147_v17  ;;  %v155_v23 = vsel %vm72_vm0, %v26_v2, -inf  ;;  %v37_v1 = vld [vmem:[%s817_s0 + $0xe8] sm:$0x1]  ;;  %v39_v12 = vld [vmem:[%s817_s0 + $0xf8] sm:$0x1] }
  0x12   :  { %v395_v62 = vsel %vm394_vm2, %v91_v49, %v82_v47  ;;  %v538_v14 = vmax.f32 %v107_v59, %v108_v3  ;;  %v548_v24 = vmax.f32 %v116_v4, %v117_v15  ;;  %v140_v25 = vrot.slane %v139_v16, 4 }
  0x13   :  { %v525_v6 = vsel %vm396_vm3, %v100_v54, %v395_v62  ;;  %v156_v26 = vsel %vm74_vm1, %v27_v7, -inf  ;;  %v164_v27 = vsel %vm72_vm0, %v28_v8, -inf  ;;  %v125_v29 = vmax.f32 %v123_v9, %v124_v20  ;;  %v38_v7 = vld [vmem:[%s817_s0 + $0xf0] sm:$0xff] }
  0x14   :  { %v133_v30 = vrot.slane %v132_v21, 2  ;;  %v149_v31 = vrot.slane %v148_v22, 4  ;;  %v157_v32 = vmax.f32 %v155_v23, %v156_v26  ;;  %v141_v33 = vmax.f32 %v139_v16, %v140_v25  ;;  %v41_v23 = vld [vmem:[%s817_s0 + $0x108] sm:$0x1] }
  0x15   :  { %v165_v34 = vsel %vm74_vm1, %v29_v13, -inf  ;;  %v173_v35 = vsel %vm72_vm0, %v30_v18, -inf  ;;  %v174_v36 = vsel %vm74_vm1, %v31_v19, -inf  ;;  %v126_v38 = vrot.slane %v125_v29, 1  ;;  %v40_v18 = vld [vmem:[%s817_s0 + $0x100] sm:$0xff] }
  0x16   :  { %v134_v39 = vmax.f32 %v132_v21, %v133_v30  ;;  %v150_v40 = vmax.f32 %v148_v22, %v149_v31  ;;  %v158_v41 = vrot.slane %v157_v32, 4  ;;  %v142_v42 = vrot.slane %v141_v33, 2 }
  0x17   :  { %v166_v43 = vmax.f32 %v164_v27, %v165_v34  ;;  %v175_v44 = vmax.f32 %v173_v35, %v174_v36  ;;  %v182_v45 = vsel %vm72_vm0, %v32_v28, -inf  ;;  %v565_v47 = vmax.f32 %v125_v29, %v126_v38  ;;  %v43_v34 = vld [vmem:[%s817_s0 + $0x118] sm:$0x1]  ;;  %v44_v35 = vld [vmem:[%s817_s0 + $0x120] sm:$0xff] }
  0x18   :  { %v135_v48 = vrot.slane %v134_v39, 1  ;;  %v151_v49 = vrot.slane %v150_v40, 2  ;;  %v159_v50 = vmax.f32 %v157_v32, %v158_v41  ;;  %v143_v52 = vmax.f32 %v141_v33, %v142_v42  ;;  %v42_v33 = vld [vmem:[%s817_s0 + $0x110] sm:$0xff] }
  0x19   :  { %v167_v53 = vrot.slane %v166_v43, 4  ;;  %v176_v54 = vrot.slane %v175_v44, 4  ;;  %v183_v55 = vsel %vm74_vm1, %v33_v37, -inf  ;;  %v191_v0 = vsel %vm72_vm0, %v34_v46, -inf }
  0x1a   :  { %v571_v56 = vmax.f32 %v134_v39, %v135_v48  ;;  %v152_v57 = vmax.f32 %v150_v40, %v151_v49  ;;  %v160_v58 = vrot.slane %v159_v50, 2  ;;  %v184_v59 = vmax.f32 %v182_v45, %v183_v55  ;;  %v46_v45 = vld [vmem:[%s817_s0 + $0x130] sm:$0xff]  ;;  %v47_v55 = vld [vmem:[%s817_s0 + $0x138] sm:$0x1] }
  0x1b   :  { %v144_v61 = vrot.slane %v143_v52, 1  ;;  %v168_v62 = vmax.f32 %v166_v43, %v167_v53  ;;  %v177_v63 = vmax.f32 %v175_v44, %v176_v54  ;;  %v192_v5 = vsel %vm74_vm1, %v35_v51, -inf  ;;  %v45_v44 = vld [vmem:[%s817_s0 + $0x128] sm:$0x1] }
  0x1c   :  { %v153_v2 = vrot.slane %v152_v57, 1  ;;  %v161_v3 = vmax.f32 %v159_v50, %v160_v58  ;;  %v185_v4 = vrot.slane %v184_v59, 4  ;;  %v193_v11 = vmax.f32 %v191_v0, %v192_v5 }
  0x1d   :  { %v584_v8 = vmax.f32 %v143_v52, %v144_v61  ;;  %v169_v9 = vrot.slane %v168_v62, 2  ;;  %v178_v10 = vrot.slane %v177_v63, 2  ;;  %v200_v17 = vsel %vm72_vm0, %v36_v60, -inf }
  0x1e   :  { %v589_v13 = vmax.f32 %v152_v57, %v153_v2  ;;  %v162_v15 = vrot.slane %v161_v3, 1  ;;  %v186_v16 = vmax.f32 %v184_v59, %v185_v4  ;;  %v194_v21 = vrot.slane %v193_v11, 4  ;;  %v48_v57 = vld [vmem:[%s817_s0 + $0x140] sm:$0xff]  ;;  %v49_v2 = vld [vmem:[%s817_s0 + $0x148] sm:$0x1] }
  0x1f   :  { %v170_v19 = vmax.f32 %v168_v62, %v169_v9  ;;  %v179_v20 = vmax.f32 %v177_v63, %v178_v10  ;;  %v201_v22 = vsel %vm74_vm1, %v37_v1, -inf  ;;  %v209_v28 = vsel %vm72_vm0, %v38_v7, -inf }
  0x20   :  { %v599_v25 = vmax.f32 %v161_v3, %v162_v15  ;;  %v187_v26 = vrot.slane %v186_v16, 2  ;;  %v202_v27 = vmax.f32 %v200_v17, %v201_v22  ;;  %v195_v31 = vmax.f32 %v193_v11, %v194_v21  ;;  %v50_v3 = vld [vmem:[%s817_s0 + $0x150] sm:$0xff] }
  0x21   :  { %v171_v29 = vrot.slane %v170_v19, 1  ;;  %v180_v30 = vrot.slane %v179_v20, 1  ;;  %v210_v32 = vsel %vm74_vm1, %v39_v12, -inf  ;;  %v218_v39 = vsel %vm72_vm0, %v40_v18, -inf }
  0x22   :  { %v188_v36 = vmax.f32 %v186_v16, %v187_v26  ;;  %v203_v37 = vrot.slane %v202_v27, 4  ;;  %v211_v38 = vmax.f32 %v209_v28, %v210_v32  ;;  %v196_v42 = vrot.slane %v195_v31, 2  ;;  %v51_v16 = vld [vmem:[%s817_s0 + $0x158] sm:$0x1]  ;;  %v53_v32 = vld [vmem:[%s817_s0 + $0x168] sm:$0x1] }
  0x23   :  { %v613_v40 = vmax.f32 %v170_v19, %v171_v29  ;;  %v615_v41 = vmax.f32 %v179_v20, %v180_v30  ;;  %v219_v43 = vsel %vm74_vm1, %v41_v23, -inf  ;;  %v227_v52 = vsel %vm72_vm0, %v42_v33, -inf }
  0x24   :  { %v189_v46 = vrot.slane %v188_v36, 1  ;;  %v204_v48 = vmax.f32 %v202_v27, %v203_v37  ;;  %v212_v49 = vrot.slane %v211_v38, 4  ;;  %v220_v50 = vmax.f32 %v218_v39, %v219_v43  ;;  %v52_v27 = vld [vmem:[%s817_s0 + $0x160] sm:$0xff]  ;;  %v54_v43 = vld [vmem:[%s817_s0 + $0x170] sm:$0xff] }
  0x25   :  { %v197_v51 = vmax.f32 %v195_v31, %v196_v42  ;;  %v228_v53 = vsel %vm74_vm1, %v43_v34, -inf  ;;  %v236_v54 = vsel %vm72_vm0, %v44_v35, -inf  ;;  %v237_v0 = vsel %vm74_vm1, %v45_v44, -inf  ;;  %v55_v44 = vld [vmem:[%s817_s0 + $0x178] sm:$0x1] }
  0x26   :  { %v633_v58 = vmax.f32 %v188_v36, %v189_v46  ;;  %v205_v59 = vrot.slane %v204_v48, 2  ;;  %v213_v60 = vmax.f32 %v211_v38, %v212_v49  ;;  %v221_v61 = vrot.slane %v220_v50, 4 }
  0x27   :  { %v198_v62 = vrot.slane %v197_v51, 1  ;;  %v229_v63 = vmax.f32 %v227_v52, %v228_v53  ;;  %v245_v1 = vsel %vm72_vm0, %v46_v45, -inf  ;;  %v238_v9 = vmax.f32 %v236_v54, %v237_v0  ;;  %v56_v54 = vld [vmem:[%s817_s0 + $0x180] sm:$0xff] }
  0x28   :  { %v206_v4 = vmax.f32 %v204_v48, %v205_v59  ;;  %v214_v5 = vrot.slane %v213_v60, 2  ;;  %v222_v7 = vmax.f32 %v220_v50, %v221_v61  ;;  %v246_v12 = vsel %vm74_vm1, %v47_v55, -inf  ;;  %v57_v61 = vld [vmem:[%s817_s0 + $0x188] sm:$0x1] }
  0x29   :  { %v643_v10 = vmax.f32 %v197_v51, %v198_v62  ;;  %v230_v11 = vrot.slane %v229_v63, 4  ;;  %v254_v15 = vsel %vm72_vm0, %v48_v57, -inf  ;;  %v239_v20 = vrot.slane %v238_v9, 4 }
  0x2a   :  { %v207_v17 = vrot.slane %v206_v4, 1  ;;  %v215_v18 = vmax.f32 %v213_v60, %v214_v5  ;;  %v223_v19 = vrot.slane %v222_v7, 2  ;;  %v247_v22 = vmax.f32 %v245_v1, %v246_v12 }
  0x2b   :  { %v231_v21 = vmax.f32 %v229_v63, %v230_v11  ;;  %v255_v23 = vsel %vm74_vm1, %v49_v2, -inf  ;;  %v263_v26 = vsel %vm72_vm0, %v50_v3, -inf  ;;  %v240_v31 = vmax.f32 %v238_v9, %v239_v20  ;;  %v58_v2 = vld [vmem:[%s817_s0 + $0x190] sm:$0xff]  ;;  %v59_v9 = vld [vmem:[%s817_s0 + $0x198] sm:$0x1] }
  0x2c   :  { %v655_v28 = vmax.f32 %v206_v4, %v207_v17  ;;  %v216_v29 = vrot.slane %v215_v18, 1  ;;  %v224_v30 = vmax.f32 %v222_v7, %v223_v19  ;;  %v248_v34 = vrot.slane %v247_v22, 4 }
  0x2d   :  { %v232_v33 = vrot.slane %v231_v21, 2  ;;  %v256_v35 = vmax.f32 %v254_v15, %v255_v23  ;;  %v264_v36 = vsel %vm74_vm1, %v51_v16, -inf  ;;  %v241_v39 = vrot.slane %v240_v31, 2 }
  0x2e   :  { %v661_v37 = vmax.f32 %v215_v18, %v216_v29  ;;  %v225_v38 = vrot.slane %v224_v30, 1  ;;  %v265_v42 = vmax.f32 %v263_v26, %v264_v36  ;;  %v249_v46 = vmax.f32 %v247_v22, %v248_v34  ;;  %v61_v22 = vld [vmem:[%s817_s0 + $0x1a8] sm:$0x1]  ;;  %v62_v34 = vld [vmem:[%s817_s0 + $0x1b0] sm:$0xff] }
  0x2f   :  { %v233_v45 = vmax.f32 %v231_v21, %v232_v33  ;;  %v257_v48 = vrot.slane %v256_v35, 4  ;;  %v272_v49 = vsel %vm72_vm0, %v52_v27, -inf  ;;  %v242_v51 = vmax.f32 %v240_v31, %v241_v39  ;;  %v60_v21 = vld [vmem:[%s817_s0 + $0x1a0] sm:$0xff] }
  0x30   :  { %v670_v50 = vmax.f32 %v224_v30, %v225_v38  ;;  %v266_v52 = vrot.slane %v265_v42, 4  ;;  %v273_v53 = vsel %vm74_vm1, %v53_v32, -inf  ;;  %v250_v57 = vrot.slane %v249_v46, 2 }
  0x31   :  { %v234_v55 = vrot.slane %v233_v45, 1  ;;  %v258_v59 = vmax.f32 %v256_v35, %v257_v48  ;;  %v274_v60 = vmax.f32 %v272_v49, %v273_v53  ;;  %v243_v62 = vrot.slane %v242_v51, 1  ;;  %v63_v35 = vld [vmem:[%s817_s0 + $0x1b8] sm:$0x1]  ;;  %v64_v48 = vld [vmem:[%s817_s0 + $0x1c0] sm:$0xff] }
  0x32   :  { %v267_v63 = vmax.f32 %v265_v42, %v266_v52  ;;  %v281_v0 = vsel %vm72_vm0, %v54_v43, -inf  ;;  %v282_v1 = vsel %vm74_vm1, %v55_v44, -inf  ;;  %v251_v4 = vmax.f32 %v249_v46, %v250_v57  ;;  %v65_v49 = vld [vmem:[%s817_s0 + $0x1c8] sm:$0x1] }
  0x33   :  { %v684_v3 = vmax.f32 %v233_v45, %v234_v55  ;;  %v259_v5 = vrot.slane %v258_v59, 2  ;;  %v275_v7 = vrot.slane %v274_v60, 4  ;;  %v689_v11 = vmax.f32 %v242_v51, %v243_v62  ;;  %v67_v62 = vld [vmem:[%s817_s0 + $0x1d8] sm:$0x1] }
  0x34   :  { %v268_v12 = vrot.slane %v267_v63, 2  ;;  %v283_v15 = vmax.f32 %v281_v0, %v282_v1  ;;  %v290_v16 = vsel %vm72_vm0, %v56_v54, -inf  ;;  %v252_v17 = vrot.slane %v251_v4, 1 }
  0x35   :  { %v260_v18 = vmax.f32 %v258_v59, %v259_v5  ;;  %v276_v19 = vmax.f32 %v274_v60, %v275_v7  ;;  %v291_v20 = vsel %vm74_vm1, %v57_v61, -inf  ;;  %v299_v29 = vsel %vm72_vm0, %v58_v2, -inf  ;;  %v66_v61 = vld [vmem:[%s817_s0 + $0x1d0] sm:$0xff] }
  0x36   :  { %v269_v23 = vmax.f32 %v267_v63, %v268_v12  ;;  %v284_v26 = vrot.slane %v283_v15, 4  ;;  %v292_v27 = vmax.f32 %v290_v16, %v291_v20  ;;  %v700_v30 = vmax.f32 %v251_v4, %v252_v17  ;;  %v68_v12 = vld [vmem:[%s817_s0 + $0x1e0] sm:$0xff] }
  0x37   :  { %v261_v31 = vrot.slane %v260_v18, 1  ;;  %v277_v32 = vrot.slane %v276_v19, 2  ;;  %v300_v33 = vsel %vm74_vm1, %v59_v9, -inf  ;;  %v308_v45 = vsel %vm72_vm0, %v60_v21, -inf }
  0x38   :  { %v270_v36 = vrot.slane %v269_v23, 1  ;;  %v285_v38 = vmax.f32 %v283_v15, %v284_v26  ;;  %v293_v39 = vrot.slane %v292_v27, 4  ;;  %v301_v42 = vmax.f32 %v299_v29, %v300_v33  ;;  %v71_v33 = vld [vmem:[%s817_s0 + $0x1f8] sm:$0x1] }
  0x39   :  { %v709_v43 = vmax.f32 %v260_v18, %v261_v31  ;;  %v278_v44 = vmax.f32 %v276_v19, %v277_v32  ;;  %v309_v46 = vsel %vm74_vm1, %v61_v22, -inf  ;;  %v317_v59 = vsel %vm72_vm0, %v62_v34, -inf  ;;  %v69_v19 = vld [vmem:[%s817_s0 + $0x1e8] sm:$0x1]  ;;  %v70_v32 = vld [vmem:[%s817_s0 + $0x1f0] sm:$0xff] }
  0x3a   :  { %v719_v51 = vmax.f32 %v269_v23, %v270_v36  ;;  %v286_v52 = vrot.slane %v285_v38, 2  ;;  %v294_v53 = vmax.f32 %v292_v27, %v293_v39  ;;  %v302_v54 = vrot.slane %v301_v42, 4 }
  0x3b   :  { %v279_v55 = vrot.slane %v278_v44, 1  ;;  %v310_v57 = vmax.f32 %v308_v45, %v309_v46  ;;  %v318_v60 = vsel %vm74_vm1, %v63_v35, -inf  ;;  %v326_v7 = vsel %vm72_vm0, %v64_v48, -inf }
  0x3c   :  { %v287_v63 = vmax.f32 %v285_v38, %v286_v52  ;;  %v295_v0 = vrot.slane %v294_v53, 2  ;;  %v303_v1 = vmax.f32 %v301_v42, %v302_v54  ;;  %v319_v2 = vmax.f32 %v317_v59, %v318_v60 }
  0x3d   :  { %v729_v4 = vmax.f32 %v278_v44, %v279_v55  ;;  %v311_v5 = vrot.slane %v310_v57, 4  ;;  %v327_v9 = vsel %vm74_vm1, %v65_v49, -inf  ;;  %v335_v22 = vsel %vm72_vm0, %v66_v61, -inf }
  0x3e   :  { %v288_v15 = vrot.slane %v287_v63, 1  ;;  %v296_v16 = vmax.f32 %v294_v53, %v295_v0  ;;  %v304_v17 = vrot.slane %v303_v1, 2  ;;  %v320_v18 = vrot.slane %v319_v2, 4 }
  0x3f   :  { %v312_v20 = vmax.f32 %v310_v57, %v311_v5  ;;  %v328_v21 = vmax.f32 %v326_v7, %v327_v9  ;;  %v336_v23 = vsel %vm74_vm1, %v67_v62, -inf  ;;  %v344_v38 = vsel %vm72_vm0, %v68_v12, -inf }
  0x40   :  { %v741_v26 = vmax.f32 %v287_v63, %v288_v15  ;;  %v297_v27 = vrot.slane %v296_v16, 1  ;;  %v305_v29 = vmax.f32 %v303_v1, %v304_v17  ;;  %v321_v31 = vmax.f32 %v319_v2, %v320_v18 }
  0x41   :  { %v313_v34 = vrot.slane %v312_v20, 2  ;;  %v329_v35 = vrot.slane %v328_v21, 4  ;;  %v337_v36 = vmax.f32 %v335_v22, %v336_v23  ;;  %v345_v45 = vsel %vm74_vm1, %v69_v19, -inf }
  0x42   :  { %v298_v39 = vmax.f32 %v296_v16, %v297_v27  ;;  %v306_v42 = vrot.slane %v305_v29, 1  ;;  %v322_v44 = vrot.slane %v321_v31, 2  ;;  %v346_v52 = vmax.f32 %v344_v38, %v345_v45 }
  0x43   :  { %v314_v46 = vmax.f32 %v312_v20, %v313_v34  ;;  %v330_v48 = vmax.f32 %v328_v21, %v329_v35  ;;  %v338_v49 = vrot.slane %v337_v36, 4  ;;  %v353_v55 = vsel %vm72_vm0, %v70_v32, -inf }
  0x44   :  { %v307_v53 = vmax.f32 %v305_v29, %v306_v42  ;;  %v323_v54 = vmax.f32 %v321_v31, %v322_v44  ;;  %v354_v57 = vsel %vm74_vm1, %v71_v33, -inf  ;;  %v347_v62 = vrot.slane %v346_v52, 4 }
  0x45   :  { %v315_v59 = vrot.slane %v314_v46, 1  ;;  %v331_v60 = vrot.slane %v330_v48, 2  ;;  %v339_v61 = vmax.f32 %v337_v36, %v338_v49  ;;  %v355_v0 = vmax.f32 %v353_v55, %v354_v57 }
  0x46   :  { %v324_v63 = vrot.slane %v323_v54, 1  ;;  %v399_v1 = vsel %vm398_vm4, %v538_v14, %v525_v6  ;;  %vm402_vm6 = vcmask 1045509   ;;  %v348_v9 = vmax.f32 %v346_v52, %v347_v62 }
  0x47   :  { %v316_v2 = vmax.f32 %v314_v46, %v315_v59  ;;  %v332_v5 = vmax.f32 %v330_v48, %v331_v60  ;;  %v340_v7 = vrot.slane %v339_v61, 2  ;;  %v356_v15 = vrot.slane %v355_v0, 4 }
  0x48   :  { %v325_v12 = vmax.f32 %v323_v54, %v324_v63  ;;  %v401_v16 = vsel %vm400_vm5, %v548_v24, %v399_v1  ;;  %vm404_vm7 = vcmask 1046534   ;;  %v349_v19 = vrot.slane %v348_v9, 2 }
  0x49   :  { %v333_v17 = vrot.slane %v332_v5, 1  ;;  %v341_v18 = vmax.f32 %v339_v61, %v340_v7  ;;  %v403_v20 = vsel %vm402_vm6, %v565_v47, %v401_v16  ;;  %v357_v21 = vmax.f32 %v355_v0, %v356_v15 }
  0x4a   :  { %v405_v6 = vsel %vm404_vm7, %v571_v56, %v403_v20  ;;  %vm406_vm8 = vcmask 1047559   ;;  %v408_v14 = vsel %vm394_vm2, %v599_v25, %v589_v13  ;;  %v350_v27 = vmax.f32 %v348_v9, %v349_v19 }
  0x4b   :  { %v334_v22 = vmax.f32 %v332_v5, %v333_v17  ;;  %v342_v23 = vrot.slane %v341_v18, 1  ;;  %v407_v24 = vsel %vm406_vm8, %v584_v8, %v405_v6  ;;  %v358_v29 = vrot.slane %v357_v21, 2 }
  0x4c   :  { %v409_v31 = vsel %vm396_vm3, %v613_v40, %v408_v14  ;;  %v415_v47 = vsel %vm394_vm2, %v684_v3, %v670_v50  ;;  %v422_v56 = vsel %vm394_vm2, %v307_v53, %v298_v39  ;;  %433 = vst.msk [vmem:[%s818_s1] sm:$0xff] %vm72_vm0, %v407_v24  ;;  %v351_v25 = vrot.slane %v350_v27, 1 }
  0x4d   :  { %v343_v13 = vmax.f32 %v341_v18, %v342_v23  ;;  %v410_v8 = vsel %vm398_vm4, %v615_v41, %v409_v31  ;;  %v416_v32 = vsel %vm396_vm3, %v689_v11, %v415_v47  ;;  %v359_v40 = vmax.f32 %v357_v21, %v358_v29 }
  0x4e   :  { %v411_v33 = vsel %vm400_vm5, %v633_v58, %v410_v8  ;;  %v417_v50 = vsel %vm398_vm4, %v700_v30, %v416_v32  ;;  %v423_v3 = vsel %vm396_vm3, %v316_v2, %v422_v56  ;;  %v352_v34 = vmax.f32 %v350_v27, %v351_v25 }
  0x4f   :  { %v412_v35 = vsel %vm402_vm6, %v643_v10, %v411_v33  ;;  %v418_v36 = vsel %vm400_vm5, %v709_v43, %v417_v50  ;;  %v424_v41 = vsel %vm398_vm4, %v325_v12, %v423_v3  ;;  %v360_v38 = vrot.slane %v359_v40, 1 }
  0x50   :  { %v413_v11 = vsel %vm404_vm7, %v655_v28, %v412_v35  ;;  %v419_v58 = vsel %vm402_vm6, %v719_v51, %v418_v36  ;;  %v425_v30 = vsel %vm400_vm5, %v334_v22, %v424_v41 }
  0x51   :  { %v414_v39 = vsel %vm406_vm8, %v661_v37, %v413_v11  ;;  %v420_v10 = vsel %vm404_vm7, %v729_v4, %v419_v58  ;;  %v426_v42 = vsel %vm402_vm6, %v343_v13, %v425_v30  ;;  %v361_v43 = vmax.f32 %v359_v40, %v360_v38 }
  0x52   :  { %v421_v44 = vsel %vm406_vm8, %v741_v26, %v420_v10  ;;  %v427_v45 = vsel %vm404_vm7, %v352_v34, %v426_v42  ;;  %434 = vst.msk [vmem:[%s818_s1 + $0x8] sm:$0xff] %vm72_vm0, %v414_v39 }
  0x53   :  { %435 = vst.msk [vmem:[%s818_s1 + $0x10] sm:$0xff] %vm72_vm0, %v421_v44  ;;  %v428_v28 = vsel %vm406_vm8, %v361_v43, %v427_v45 }
  0x54   :  { %436 = vst.msk [vmem:[%s818_s1 + $0x18] sm:$0xff] %vm72_vm0, %v428_v28 }

// kernel: seresnext_forward.16
= control target key start
LH: loop header
LB: loop body
LE: loop exit
PB: predicated region body
PF: predicated region fallthrough
CT: control target
= control target key end

     0   :  { %vm44_vm0 = vcmask 130048   ;;  %s180_s1 = inlined_call_operand.vmem [shape: bf16[16,16], index: 1, kind: input, shape index: {}]   ;;  %s181_s0 = inlined_call_operand.vmem [shape: bf16[32,16], index: 0, kind: input, shape index: {}]   ;;  %s182_s2 = inlined_call_operand.vmem [shape: f32[1,16], index: 2, kind: input, shape index: {}]   ;;  %s183_s3 = inlined_call_operand.vmem [shape: f32[32,16], index: 3, kind: output, shape index: {}]  }
   0x1   :  { %v127_v0 = vld [vmem:[%s180_s1] sm:$0xff]   ;;  %v129_v2 = vld [vmem:[%s181_s0 + $0x8] sm:$0xff]  }
   0x2   :  { %v128_v1 = vld [vmem:[%s181_s0] sm:$0xff]   ;;  %121 = vmatprep.subr.bf16.mxu0 %v127_v0 }
   0x3   :  { %122 = vmatpush3.bf16.msra.mxu0 %v127_v0  ;;  %123 = vmatprep.mubr.msk.bf16.mxu0 %vm44_vm0, %v128_v1  ;;  %v112_v3 = vld [vmem:[%s182_s2] ss:$0 sm:$0xff] }
   0x6   :  { %124 = vmatmul.mubr.msk.bf16.vlgmr.msra.gmra.mrb[0].mxu0 %vm44_vm0, %v129_v2 }
  0xd9   :  { %v125_v4 = vpop.f32.mrb[0].mxu0 }
  0xda   :  { %v94_v5 = vadd.f32 %v125_v4, %v112_v3  ;;  %v85_v6 = vpop.f32.mrb[1].mxu0 }
  0xdb   :  { %v86_v7 = vadd.f32 %v112_v3, %v85_v6  ;;  %v126_v8 = vpop.f32.mrb[2].mxu0 }
  0xdc   :  { %v102_v9 = vmax.f32 %v94_v5, 0.0  ;;  %v97_v10 = vadd.f32 %v126_v8, %v112_v3  ;;  %v88_v11 = vpop.f32.mrb[3].mxu0 }
  0xdd   :  { %v100_v12 = vmax.f32 %v86_v7, 0.0  ;;  %v89_v13 = vadd.f32 %v112_v3, %v88_v11 }
  0xde   :  { %106 = vst.msk [vmem:[%s183_s3 + $0x10] sm:$0xff] %vm44_vm0, %v102_v9  ;;  %v103_v14 = vmax.f32 %v97_v10, 0.0 }
  0xdf   :  { %104 = vst.msk [vmem:[%s183_s3] sm:$0xff] %vm44_vm0, %v100_v12  ;;  %v101_v15 = vmax.f32 %v89_v13, 0.0 }
  0xe0   :  { %107 = vst.msk [vmem:[%s183_s3 + $0x18] sm:$0xff] %vm44_vm0, %v103_v14 }
  0xe1   :  { %105 = vst.msk [vmem:[%s183_s3 + $0x8] sm:$0xff] %vm44_vm0, %v101_v15 }

// kernel: seresnext_forward.15
= control target key start
LH: loop header
LB: loop body
LE: loop exit
PB: predicated region body
PF: predicated region fallthrough
CT: control target
= control target key end

     0   :  { %vm44_vm0 = vcmask 130048   ;;  %vm100_vm1 = vcmask 261120   ;;  %s171_s1 = inlined_call_operand.vmem [shape: bf16[16,32], index: 1, kind: input, shape index: {}]   ;;  %s172_s0 = inlined_call_operand.vmem [shape: bf16[32,16], index: 0, kind: input, shape index: {}]   ;;  %s173_s2 = inlined_call_operand.vmem [shape: f32[1,32], index: 2, kind: input, shape index: {}]   ;;  %s174_s3 = inlined_call_operand.vmem [shape: f32[32,32], index: 3, kind: output, shape index: {}]  }
   0x1   :  { %v124_v0 = vld [vmem:[%s171_s1] sm:$0xff]   ;;  %v126_v2 = vld [vmem:[%s172_s0 + $0x8] sm:$0xff]  }
   0x2   :  { %v125_v1 = vld [vmem:[%s172_s0] sm:$0xff]   ;;  %118 = vmatprep.subr.bf16.mxu0 %v124_v0 }
   0x3   :  { %119 = vmatpush3.bf16.msra.mxu0 %v124_v0  ;;  %120 = vmatprep.mubr.msk.bf16.mxu0 %vm44_vm0, %v125_v1  ;;  %v109_v3 = vld [vmem:[%s173_s2] ss:$0 sm:$0xff] }
   0x6   :  { %121 = vmatmul.mubr.msk.bf16.vlgmr.msra.gmra.mrb[0].mxu0 %vm44_vm0, %v126_v2 }
  0xd9   :  { %v122_v4 = vpop.f32.mrb[0].mxu0 }
  0xda   :  { %v94_v5 = vadd.f32 %v122_v4, %v109_v3  ;;  %v85_v6 = vpop.f32.mrb[1].mxu0 }
  0xdb   :  { %v86_v7 = vadd.f32 %v109_v3, %v85_v6  ;;  %v123_v8 = vpop.f32.mrb[2].mxu0 }
  0xdc   :  { %103 = vst.msk [vmem:[%s174_s3 + $0x10] sm:$0xff] %vm100_vm1, %v94_v5  ;;  %v97_v9 = vadd.f32 %v123_v8, %v109_v3  ;;  %v88_v10 = vpop.f32.mrb[3].mxu0 }
  0xdd   :  { %101 = vst.msk [vmem:[%s174_s3] sm:$0xff] %vm100_vm1, %v86_v7  ;;  %v89_v11 = vadd.f32 %v109_v3, %v88_v10 }
  0xde   :  { %104 = vst.msk [vmem:[%s174_s3 + $0x18] sm:$0xff] %vm100_vm1, %v97_v9 }
  0xdf   :  { %102 = vst.msk [vmem:[%s174_s3 + $0x8] sm:$0xff] %vm100_vm1, %v89_v11 }

// kernel: seresnext_forward.17
= control target key start
LH: loop header
LB: loop body
LE: loop exit
PB: predicated region body
PF: predicated region fallthrough
CT: control target
= control target key end

     0   :  { %v234_v0 = vmov 0   ;;  %vm116_vm0 = vcmask 130048   ;;  %s315_s1 = inlined_call_operand.vmem [shape: bf16[144,16], index: 1, kind: input, shape index: {}]   ;;  %s316_s0 = inlined_call_operand.vmem [shape: bf16[32,144], index: 0, kind: input, shape index: {}]   ;;  %s317_s2 = inlined_call_operand.vmem [shape: f32[1,16], index: 2, kind: input, shape index: {}]   ;;  %s318_s3 = inlined_call_operand.vmem [shape: f32[32,16], index: 3, kind: output, shape index: {}]  }
   0x1   :  { %123 = vmatprep.subr.bf16.mxu0 %v234_v0  ;;  %200 = vmatprep.subr.bf16.mxu1 %v234_v0  ;;  %v219_v1 = vld [vmem:[%s315_s1] sm:$0xff]   ;;  %v220_v2 = vld [vmem:[%s315_s1 + $0x8] sm:$0xff]   ;;  %v221_v3 = vld [vmem:[%s315_s1 + $0x10] sm:$0xff]  }
   0x2   :  { %124 = vmatpush1.bf16.msra.mxu0 %v219_v1  ;;  %209 = vmatpush1.bf16.msra.mxu1 %v219_v1  ;;  %v222_v4 = vld [vmem:[%s315_s1 + $0x18] sm:$0xff]   ;;  %v230_v5 = vld [vmem:[%s316_s0 + $0x4] ss:$8 sps:$4 sm:$0xff]   ;;  %v225_v9 = vld [vmem:[%s315_s1 + $0x30] sm:$0xff]  }
   0x3   :  { %125 = vmatprep.subr.bf16.mxu0 %v234_v0  ;;  %201 = vmatprep.subr.bf16.mxu1 %v234_v0  ;;  %v233_v6 = vld [vmem:[%s316_s0 + $0x14] ss:$8 sps:$4 sm:$0xff]   ;;  %v223_v7 = vld [vmem:[%s315_s1 + $0x20] sm:$0xff]   ;;  %v224_v8 = vld [vmem:[%s315_s1 + $0x28] sm:$0xff]  }
   0x4   :  { %198 = vmatprep.mubr.msk.bf16.mxu0 %vm116_vm0, %v230_v5  ;;  %199 = vmatprep.mubr.msk.bf16.mxu1 %vm116_vm0, %v233_v6  ;;  %v226_v10 = vld [vmem:[%s315_s1 + $0x38] sm:$0xff]   ;;  %v227_v11 = vld [vmem:[%s315_s1 + $0x40] sm:$0xff]  }
   0x5   :  { %v228_v12 = vld [vmem:[%s316_s0] ss:$8 sps:$4 sm:$0xff]   ;;  %v231_v13 = vld [vmem:[%s316_s0 + $0x10] ss:$8 sps:$4 sm:$0xff]  }
   0x6   :  { %126 = vmatpush1.bf16.msra.mxu0 %v220_v2  ;;  %210 = vmatpush1.bf16.msra.mxu1 %v220_v2  ;;  %v184_v14 = vld [vmem:[%s317_s2] ss:$0 sm:$0xff] }
   0x7   :  { %127 = vmatprep.subr.bf16.mxu0 %v234_v0  ;;  %202 = vmatprep.subr.bf16.mxu1 %v234_v0 }
   0xa   :  { %128 = vmatpush1.bf16.msra.mxu0 %v221_v3  ;;  %211 = vmatpush1.bf16.msra.mxu1 %v221_v3 }
   0xb   :  { %129 = vmatprep.subr.bf16.mxu0 %v234_v0  ;;  %203 = vmatprep.subr.bf16.mxu1 %v234_v0 }
   0xe   :  { %130 = vmatpush1.bf16.msra.mxu0 %v222_v4  ;;  %212 = vmatpush1.bf16.msra.mxu1 %v222_v4 }
   0xf   :  { %131 = vmatprep.subr.bf16.mxu0 %v234_v0  ;;  %204 = vmatprep.subr.bf16.mxu1 %v234_v0 }
  0x12   :  { %132 = vmatpush1.bf16.msra.mxu0 %v223_v7  ;;  %213 = vmatpush1.bf16.msra.mxu1 %v223_v7 }
  0x13   :  { %133 = vmatprep.subr.bf16.mxu0 %v234_v0  ;;  %205 = vmatprep.subr.bf16.mxu1 %v234_v0 }
  0x16   :  { %134 = vmatpush1.bf16.msra.mxu0 %v224_v8  ;;  %214 = vmatpush1.bf16.msra.mxu1 %v224_v8 }
  0x17   :  { %135 = vmatprep.subr.bf16.mxu0 %v234_v0  ;;  %206 = vmatprep.subr.bf16.mxu1 %v234_v0 }
  0x1a   :  { %136 = vmatpush1.bf16.msra.mxu0 %v225_v9  ;;  %215 = vmatpush1.bf16.msra.mxu1 %v225_v9 }
  0x1b   :  { %137 = vmatprep.subr.bf16.mxu0 %v234_v0  ;;  %207 = vmatprep.subr.bf16.mxu1 %v234_v0 }
  0x1e   :  { %138 = vmatpush1.bf16.msra.mxu0 %v226_v10  ;;  %216 = vmatpush1.bf16.msra.mxu1 %v226_v10 }
  0x1f   :  { %139 = vmatprep.subr.bf16.mxu0 %v234_v0  ;;  %208 = vmatprep.subr.bf16.mxu1 %v234_v0 }
  0x22   :  { %140 = vmatpush1.bf16.msra.mxu0 %v227_v11  ;;  %217 = vmatpush1.bf16.msra.mxu1 %v227_v11 }
  0x25   :  { %156 = vmatmul.mubr.bf16.vlgmr.msra.gmra.mrb[0].mxu0 %v228_v12  ;;  %164 = vmatmul.mubr.bf16.vlgmr.msra.gmra.mrb[0].mxu1 %v231_v13 }
  0xf8   :  { %v157_v15 = vpop.f32.mrb[0].mxu0  ;;  %v165_v16 = vpop.f32.mrb[0].mxu1 }
  0xf9   :  { %v158_v17 = vadd.f32 %v184_v14, %v157_v15  ;;  %v166_v18 = vadd.f32 %v184_v14, %v165_v16  ;;  %v159_v19 = vpop.f32.mrb[1].mxu0  ;;  %v167_v20 = vpop.f32.mrb[1].mxu1 }
  0xfa   :  { %v160_v21 = vpop.f32.mrb[2].mxu0  ;;  %v168_v22 = vpop.f32.mrb[2].mxu1 }
  0xfb   :  { %v172_v23 = vmax.f32 %v158_v17, 0.0  ;;  %v174_v24 = vmax.f32 %v166_v18, 0.0  ;;  %v161_v25 = vadd.f32 %v184_v14, %v160_v21  ;;  %v169_v26 = vadd.f32 %v184_v14, %v168_v22  ;;  %v162_v27 = vpop.f32.mrb[3].mxu0  ;;  %v170_v28 = vpop.f32.mrb[3].mxu1 }
  0xfd   :  { %176 = vst.msk [vmem:[%s318_s3] sm:$0xff] %vm116_vm0, %v172_v23  ;;  %178 = vst.msk [vmem:[%s318_s3 + $0x10] sm:$0xff] %vm116_vm0, %v174_v24  ;;  %v173_v29 = vmax.f32 %v161_v25, 0.0  ;;  %v175_v30 = vmax.f32 %v169_v26, 0.0 }
  0xff   :  { %177 = vst.msk [vmem:[%s318_s3 + $0x8] sm:$0xff] %vm116_vm0, %v173_v29  ;;  %179 = vst.msk [vmem:[%s318_s3 + $0x18] sm:$0xff] %vm116_vm0, %v175_v30 }

// kernel: seresnext_forward.20
= control target key start
LH: loop header
LB: loop body
LE: loop exit
PB: predicated region body
PF: predicated region fallthrough
CT: control target
= control target key end

     0   :  { %v108_v0 = vmov 0.0   ;;  %vm109_vm0 = vmmov 0   ;;  %vm39_vm1 = vcmask 261120   ;;  %vm83_vm2 = vcmask 523264   ;;  %s145_s1 = inlined_call_operand.vmem [shape: bf16[32,64], index: 1, kind: input, shape index: {}]   ;;  %s146_s0 = inlined_call_operand.vmem [shape: bf16[8,32], index: 0, kind: input, shape index: {}]   ;;  %s147_s2 = inlined_call_operand.vmem [shape: f32[1,64], index: 2, kind: input, shape index: {}]   ;;  %s148_s3 = inlined_call_operand.vmem [shape: f32[8,64], index: 3, kind: output, shape index: {}]  }
   0x1   :  { %96 = vmatprep.subr.bf16.mxu0 %v108_v0  ;;  %v106_v1 = vld [vmem:[%s145_s1] sm:$0xff]   ;;  %100 = vmatprep.mubr.msk.bf16.mxu0 %vm109_vm0, %v108_v0  ;;  %v107_v2 = vld [vmem:[%s145_s1 + $0x8] sm:$0xff]  }
   0x2   :  { %97 = vmatpush3.bf16.msra.mxu0 %v106_v1  ;;  %v15_v3 = vld [vmem:[%s146_s0] sm:$0xf] }
   0x3   :  { %98 = vmatprep.subr.bf16.mxu0 %v108_v0  ;;  %v89_v4 = vld [vmem:[%s147_s2] ss:$0 sm:$0xff] }
   0x6   :  { %99 = vmatpush3.bf16.msra.mxu0 %v107_v2 }
   0x9   :  { %101 = vmatmul.mubr.msk.bf16.vlgmr.msra.gmra.mrb[0].mxu0 %vm39_vm1, %v15_v3 }
  0xdc   :  { %v77_v5 = vpop.f32.mrb[0].mxu0 }
  0xdd   :  { %v78_v6 = vadd.f32 %v89_v4, %v77_v5  ;;  %v102_v7 = vpop.f32.mrb[1].mxu0 }
  0xde   :  { %v80_v8 = vpop.f32.mrb[2].mxu0 }
  0xdf   :  { %84 = vst.msk [vmem:[%s148_s3] sm:$0xff] %vm83_vm2, %v78_v6  ;;  %v103_v9 = vpop.f32.mrb[3].mxu0 }

// kernel: seresnext_forward.19
= control target key start
LH: loop header
LB: loop body
LE: loop exit
PB: predicated region body
PF: predicated region fallthrough
CT: control target
= control target key end

     0   :  { %vm27_vm0 = vcmask 261120   ;;  %v324_v0 = vmov 0.0|0.0   ;;  %vm325_vm1 = vmmov 0   ;;  %v326_v4 = vmov 0.0   ;;  %s445_s1 = inlined_call_operand.vmem [shape: f32[32,8], index: 1, kind: input, shape index: {}]   ;;  %s446_s0 = inlined_call_operand.vmem [shape: f32[2,16,32], index: 0, kind: input, shape index: {}]   ;;  %s447_s3 = inlined_call_operand.vmem [shape: f32[8,32], index: 3, kind: input, shape index: {}]   ;;  %s448_s2 = inlined_call_operand.vmem [shape: f32[1,8], index: 2, kind: input, shape index: {}]   ;;  %s449_s4 = inlined_call_operand.vmem [shape: f32[1,32], index: 4, kind: input, shape index: {}]   ;;  %s450_s5 = inlined_call_operand.vmem [shape: f32[2,16,32], index: 5, kind: input, shape index: {}]   ;;  %s451_s6 = inlined_call_operand.vmem [shape: f32[2,16,32], index: 6, kind: output, shape index: {}]  }
   0x1   :  { %310 = vmatprep.subr.bf16.mxu0 %v324_v0  ;;  %v49_v1 = vld [vmem:[%s445_s1] sm:$0xff]  ;;  %v50_v2 = vld [vmem:[%s445_s1 + $0x8] sm:$0xff]  ;;  %v51_v3 = vld [vmem:[%s445_s1 + $0x10] sm:$0xff]  ;;  %302 = vmatprep.mubr.msk.f32.mxu0 %vm325_vm1, %v326_v4  ;;  %vm62_vm2 = vcmask 1041409   ;;  %vm145_vm3 = vcmask 64512   ;;  %v229_v48 = vlaneseq }
   0x2   :  { %v311_v5 = vpack.c.bf16 %v50_v2, %v49_v1  ;;  %v52_v6 = vld [vmem:[%s445_s1 + $0x18] sm:$0xff]  ;;  %v378_v7 = vld [vmem:[%s446_s0] sm:$0xff]  ;;  %v383_v8 = vld [vmem:[%s446_s0 + $0x8] sm:$0xff]  ;;  %305 = vmatprep.subr.mxu1 %v326_v4  ;;  %307 = vmatprep.mubr.msk.f32.mxu1 %vm325_vm1, %v326_v4  ;;  %v327_v46 = vmov 1966171168  }
   0x3   :  { %v388_v9 = vld [vmem:[%s446_s0 + $0x10] sm:$0xff]  ;;  %v393_v10 = vld [vmem:[%s446_s0 + $0x18] sm:$0xff]  ;;  %v28_v11 = vsel %vm27_vm0, %v378_v7, 0.0  ;;  %v29_v12 = vsel %vm27_vm0, %v383_v8, 0.0  ;;  %v314_v13 = vpack.c.bf16 %v52_v6, %v51_v3  ;;  %v137_v33 = vld [vmem:[%s447_s3] sm:$0xff]  ;;  %v227_v47 = vunpack.c.l.s4 %v327_v46 }
   0x4   :  { %312 = vmatpush3.bf16.msra.mxu0 %v311_v5  ;;  %v30_v14 = vadd.f32 %v29_v12, %v28_v11  ;;  %v37_v15 = vsel %vm27_vm0, %v388_v9, 0.0  ;;  %v38_v16 = vsel %vm27_vm0, %v393_v10, 0.0  ;;  %306 = vmatpush3.msra.mxu1 %v137_v33  ;;  %v282_v34 = vld [vmem:[%s448_s2] ss:$0 sm:$0xff]  ;;  %v230_v50 = vshrl.u32 %v229_v48, 7  ;;  %v263_v60 = vld [vmem:[%s450_s5 + $0x8] sm:$0xff] }
   0x5   :  { %313 = vmatprep.subr.bf16.mxu0 %v324_v0  ;;  %v39_v17 = vadd.f32 %v38_v16, %v37_v15  ;;  %v284_v39 = vld [vmem:[%s449_s4] ss:$0 sm:$0xff]  ;;  %v228_v49 = vunpack.c.0.s8 %v227_v47  ;;  %v264_v0 = vld [vmem:[%s450_s5 + $0x10] sm:$0xff]  ;;  %v265_v1 = vld [vmem:[%s450_s5 + $0x18] sm:$0xff] }
   0x6   :  { %v31_v18 = vrot.slane %v30_v14, 4  ;;  %v250_v54 = vsub.s32 0, %v230_v50  ;;  %v262_v59 = vld [vmem:[%s450_s5] sm:$0xff] }
   0x7   :  { %v40_v19 = vrot.slane %v39_v17, 4  ;;  %v231_v51 = vsub.s32 %v228_v49, %v230_v50 }
   0x8   :  { %315 = vmatpush3.bf16.msra.mxu0 %v314_v13  ;;  %v32_v20 = vadd.f32 %v31_v18, %v30_v14 }
   0x9   :  { %v41_v21 = vadd.f32 %v40_v19, %v39_v17 }
   0xa   :  { %v33_v22 = vrot.slane %v32_v20, 2 }
   0xb   :  { %v42_v23 = vrot.slane %v41_v21, 2 }
   0xc   :  { %v34_v24 = vadd.f32 %v33_v22, %v32_v20 }
   0xd   :  { %v43_v25 = vadd.f32 %v42_v23, %v41_v21 }
   0xe   :  { %v35_v26 = vrot.slane %v34_v24, 1 }
   0xf   :  { %v44_v27 = vrot.slane %v43_v25, 1 }
  0x10   :  { %v36_v28 = vadd.f32 %v35_v26, %v34_v24 }
  0x11   :  { %v45_v29 = vadd.f32 %v44_v27, %v43_v25 }
  0x12   :  { %v47_v30 = vmul.f32 0.0625, %v36_v28 }
  0x13   :  { %v48_v31 = vmul.f32 0.0625, %v45_v29 }
  0x15   :  { %v63_v32 = vsel %vm62_vm2, %v48_v31, %v47_v30 }
  0x16   :  { %303 = vmatmul.mubr.msk.f32.vlgmr.msra.gmra.mrb[0].mxu0 %vm27_vm0, %v63_v32 }
  0xe9   :  { %v132_v35 = vpop.f32.mrb[0].mxu0 }
  0xea   :  { %v133_v36 = vadd.f32 %v282_v34, %v132_v35  ;;  %v304_v37 = vpop.f32.mrb[1].mxu0 }
  0xec   :  { %v136_v38 = vmax.f32 %v133_v36, 0.0 }
  0xee   :  { %308 = vmatmul.mubr.msk.f32.vlgmr.msra.gmra.mrb[0].mxu1 %vm145_vm3, %v136_v38 }
 0x1c1   :  { %v215_v40 = vpop.f32.mrb[0].mxu1 }
 0x1c2   :  { %v216_v41 = vadd.f32 %v284_v39, %v215_v40  ;;  %v309_v42 = vpop.f32.mrb[1].mxu1 }
 0x1c4   :  { %v286_v43 = vmul.f32 -1.442695, %v216_v41 }
 0x1c6   :  { %320 = vpow2.f32 %v286_v43 }
 0x1d0   :  { %v321_v44 = vpop.eup %320 }
 0x1d1   :  { %v222_v45 = vadd.f32 1.0, %v321_v44 }
 0x1d3   :  { %322 = vrcp.f32 %v222_v45 }
 0x1dd   :  { %v323_v52 = vpop.eup %322 }
 0x1de   :  { %v232_v53 = vrot.slane %v323_v52, %v231_v51 }
 0x1e0   :  { %v233_v55 = vcombine.high %v232_v53, %v232_v53  ;;  %v240_v56 = vrot.slane %v232_v53, %v231_v51 }
 0x1e2   :  { %v247_v57 = vrot.slane %v233_v55, %v231_v51  ;;  %v251_v58 = vrot.slane %v240_v56, %v250_v54 }
 0x1e4   :  { %v255_v61 = vrot.slane %v247_v57, %v250_v54  ;;  %v258_v62 = vmul.f32 %v251_v58, %v378_v7  ;;  %v259_v63 = vmul.f32 %v251_v58, %v383_v8 }
 0x1e6   :  { %v260_v2 = vmul.f32 %v255_v61, %v388_v9  ;;  %v261_v3 = vmul.f32 %v255_v61, %v393_v10  ;;  %v266_v4 = vadd.f32 %v262_v59, %v258_v62  ;;  %v267_v5 = vadd.f32 %v263_v60, %v259_v63 }
 0x1e8   :  { %v268_v6 = vadd.f32 %v264_v0, %v260_v2  ;;  %v269_v11 = vadd.f32 %v265_v1, %v261_v3  ;;  %v270_v12 = vmax.f32 %v266_v4, 0.0  ;;  %v271_v7 = vmax.f32 %v267_v5, 0.0 }
 0x1ea   :  { %v272_v13 = vmax.f32 %v268_v6, 0.0  ;;  %v273_v8 = vmax.f32 %v269_v11, 0.0  ;;  %274 = vst.msk [vmem:[%s451_s6] sm:$0xff] %vm27_vm0, %v270_v12  ;;  %275 = vst.msk [vmem:[%s451_s6 + $0x8] sm:$0xff] %vm27_vm0, %v271_v7 }
 0x1ec   :  { %276 = vst.msk [vmem:[%s451_s6 + $0x10] sm:$0xff] %vm27_vm0, %v272_v13  ;;  %277 = vst.msk [vmem:[%s451_s6 + $0x18] sm:$0xff] %vm27_vm0, %v273_v8 }

// kernel: seresnext_forward.21
= control target key start
LH: loop header
LB: loop body
LE: loop exit
PB: predicated region body
PF: predicated region fallthrough
CT: control target
= control target key end

     0   :  { %vm52_vm0 = vcmask 261120   ;;  %s196_s1 = inlined_call_operand.vmem [shape: bf16[32,32], index: 1, kind: input, shape index: {}]   ;;  %s197_s0 = inlined_call_operand.vmem [shape: bf16[32,32], index: 0, kind: input, shape index: {}]   ;;  %s198_s2 = inlined_call_operand.vmem [shape: f32[1,32], index: 2, kind: input, shape index: {}]   ;;  %s199_s3 = inlined_call_operand.vmem [shape: f32[32,32], index: 3, kind: output, shape index: {}]  }
   0x1   :  { %v139_v0 = vld [vmem:[%s196_s1] sm:$0xff]   ;;  %v140_v1 = vld [vmem:[%s196_s1 + $0x8] sm:$0xff]  }
   0x2   :  { %131 = vmatprep.subr.bf16.mxu0 %v139_v0  ;;  %v141_v2 = vld [vmem:[%s197_s0] sm:$0xff]   ;;  %v142_v3 = vld [vmem:[%s197_s0 + $0x8] sm:$0xff]  }
   0x3   :  { %132 = vmatpush3.bf16.msra.mxu0 %v139_v0  ;;  %135 = vmatprep.mubr.msk.bf16.mxu0 %vm52_vm0, %v141_v2  ;;  %v120_v4 = vld [vmem:[%s198_s2] ss:$0 sm:$0xff] }
   0x4   :  { %133 = vmatprep.subr.bf16.mxu0 %v140_v1 }
   0x7   :  { %134 = vmatpush3.bf16.msra.mxu0 %v140_v1 }
   0xa   :  { %136 = vmatmul.mubr.msk.bf16.vlgmr.msra.gmra.mrb[0].mxu0 %vm52_vm0, %v142_v3 }
  0xdd   :  { %v137_v5 = vpop.f32.mrb[0].mxu0 }
  0xde   :  { %v102_v6 = vadd.f32 %v137_v5, %v120_v4  ;;  %v93_v7 = vpop.f32.mrb[1].mxu0 }
  0xdf   :  { %v94_v8 = vadd.f32 %v120_v4, %v93_v7  ;;  %v138_v9 = vpop.f32.mrb[2].mxu0 }
  0xe0   :  { %v110_v10 = vmax.f32 %v102_v6, 0.0  ;;  %v105_v11 = vadd.f32 %v138_v9, %v120_v4  ;;  %v96_v12 = vpop.f32.mrb[3].mxu0 }
  0xe1   :  { %v108_v13 = vmax.f32 %v94_v8, 0.0  ;;  %v97_v14 = vadd.f32 %v120_v4, %v96_v12 }
  0xe2   :  { %114 = vst.msk [vmem:[%s199_s3 + $0x10] sm:$0xff] %vm52_vm0, %v110_v10  ;;  %v111_v15 = vmax.f32 %v105_v11, 0.0 }
  0xe3   :  { %112 = vst.msk [vmem:[%s199_s3] sm:$0xff] %vm52_vm0, %v108_v13  ;;  %v109_v16 = vmax.f32 %v97_v14, 0.0 }
  0xe4   :  { %115 = vst.msk [vmem:[%s199_s3 + $0x18] sm:$0xff] %vm52_vm0, %v111_v15 }
  0xe5   :  { %113 = vst.msk [vmem:[%s199_s3 + $0x8] sm:$0xff] %vm52_vm0, %v109_v16 }

// kernel: seresnext_forward.25
= control target key start
LH: loop header
LB: loop body
LE: loop exit
PB: predicated region body
PF: predicated region fallthrough
CT: control target
= control target key end

     0   :  { %v175_v3 = vmov 0.0   ;;  %vm16_vm0 = vcmask 519168   ;;  %vm64_vm1 = vcmask 1041409   ;;  %vm66_vm2 = vcmask 523264   ;;  %s256_s1 = inlined_call_operand.vmem [shape: f32[64,256], index: 1, kind: input, shape index: {}]   ;;  %s257_s0 = inlined_call_operand.vmem [shape: f32[2,4,64], index: 0, kind: input, shape index: {}]   ;;  %s258_s2 = inlined_call_operand.vmem [shape: f32[1,256], index: 2, kind: input, shape index: {}]   ;;  %s259_s3 = inlined_call_operand.vmem [shape: f32[2,256], index: 3, kind: output, shape index: {}]  }
   0x1   :  { %v35_v0 = vld [vmem:[%s256_s1 + $0x8] sm:$0xff]  ;;  %v37_v1 = vld [vmem:[%s256_s1 + $0x18] sm:$0xff]  ;;  %v34_v2 = vld [vmem:[%s256_s1] sm:$0xff]  ;;  %133 = vmatprep.mubr.f32.mxu0 %v175_v3  ;;  %v52_v44 = vlaneseq }
   0x2   :  { %v158_v4 = vpack.c.bf16 %v37_v1, %v35_v0  ;;  %v36_v5 = vld [vmem:[%s256_s1 + $0x10] sm:$0xff]  ;;  %v39_v6 = vld [vmem:[%s256_s1 + $0x28] sm:$0xff]  ;;  %v41_v7 = vld [vmem:[%s256_s1 + $0x38] sm:$0xff] }
   0x3   :  { %v160_v8 = vpack.c.bf16 %v36_v5, %v34_v2  ;;  %v162_v9 = vpack.c.bf16 %v41_v7, %v39_v6  ;;  %v38_v10 = vld [vmem:[%s256_s1 + $0x20] sm:$0xff]  ;;  %v40_v11 = vld [vmem:[%s256_s1 + $0x30] sm:$0xff]  ;;  %v43_v12 = vld [vmem:[%s256_s1 + $0x48] sm:$0xff]  ;;  %v53_v45 = vshrl.u32 %v52_v44, 7 }
   0x4   :  { %159 = vmatprep.subr.bf16.mxu0 %v158_v4  ;;  %v45_v13 = vld [vmem:[%s256_s1 + $0x58] sm:$0xff]  ;;  %v164_v14 = vpack.c.bf16 %v40_v11, %v38_v10  ;;  %v42_v15 = vld [vmem:[%s256_s1 + $0x40] sm:$0xff]  ;;  %v44_v17 = vld [vmem:[%s256_s1 + $0x50] sm:$0xff] }
   0x5   :  { %161 = vmatpush1.bf16.msra.mxu0 %v160_v8  ;;  %v166_v16 = vpack.c.bf16 %v45_v13, %v43_v12  ;;  %v14_v18 = vld [vmem:[%s257_s0] sm:$0xf]  ;;  %v15_v19 = vld [vmem:[%s257_s0 + $0x4] sm:$0xf]  ;;  %v47_v20 = vld [vmem:[%s256_s1 + $0x68] sm:$0xff]  ;;  %v168_v26 = vpack.c.bf16 %v44_v17, %v42_v15  ;;  %v54_v46 = vsub.s32 0, %v53_v45 }
   0x6   :  { %163 = vmatprep.subr.bf16.mxu0 %v162_v9  ;;  %v49_v21 = vld [vmem:[%s256_s1 + $0x78] sm:$0xff]  ;;  %v17_v22 = vsel %vm16_vm0, %v14_v18, 0.0  ;;  %v24_v23 = vsel %vm16_vm0, %v15_v19, 0.0  ;;  %v46_v28 = vld [vmem:[%s256_s1 + $0x60] sm:$0xff]  ;;  %v48_v29 = vld [vmem:[%s256_s1 + $0x70] sm:$0xff]  ;;  %v58_v48 = vsub.s32 1, %v53_v45 }
   0x7   :  { %v18_v24 = vrot.slane %v17_v22, 4  ;;  %v25_v25 = vrot.slane %v24_v23, 4  ;;  %v170_v27 = vpack.c.bf16 %v49_v21, %v47_v20  ;;  %v172_v34 = vpack.c.bf16 %v48_v29, %v46_v28  ;;  %v50_v47 = vld [vmem:[%s258_s2] sm:$0x3] }
   0x8   :  { %v55_v49 = vrot.slane %v50_v47, %v54_v46  ;;  %v59_v50 = vrot.slane %v50_v47, %v58_v48 }
   0x9   :  { %165 = vmatpush1.bf16.msra.mxu0 %v164_v14  ;;  %v19_v30 = vadd.f32 %v18_v24, %v17_v22  ;;  %v26_v31 = vadd.f32 %v25_v25, %v24_v23 }
   0xa   :  { %167 = vmatprep.subr.bf16.mxu0 %v166_v16 }
   0xb   :  { %v20_v32 = vrot.slane %v19_v30, 2  ;;  %v27_v33 = vrot.slane %v26_v31, 2 }
   0xd   :  { %169 = vmatpush1.bf16.msra.mxu0 %v168_v26  ;;  %v21_v35 = vadd.f32 %v20_v32, %v19_v30  ;;  %v28_v36 = vadd.f32 %v27_v33, %v26_v31 }
   0xe   :  { %171 = vmatprep.subr.bf16.mxu0 %v170_v27 }
   0xf   :  { %v22_v37 = vrot.slane %v21_v35, 1  ;;  %v29_v38 = vrot.slane %v28_v36, 1 }
  0x11   :  { %173 = vmatpush1.bf16.msra.mxu0 %v172_v34  ;;  %v23_v39 = vadd.f32 %v22_v37, %v21_v35  ;;  %v30_v40 = vadd.f32 %v29_v38, %v28_v36 }
  0x13   :  { %v32_v41 = vmul.f32 0.25, %v23_v39  ;;  %v33_v42 = vmul.f32 0.25, %v30_v40 }
  0x15   :  { %v65_v43 = vsel %vm64_vm1, %v33_v42, %v32_v41 }
  0x16   :  { %156 = vmatmul.mubr.msk.f32.vlgmr.msra.gmra.mrb[0].mxu0 %vm66_vm2, %v65_v43 }
  0xe9   :  { %v135_v51 = vpop.f32.mrb[0].mxu0 }
  0xea   :  { %v136_v52 = vadd.f32 %v135_v51, %v55_v49  ;;  %v137_v53 = vpop.f32.mrb[1].mxu0 }
  0xeb   :  { %v138_v54 = vadd.f32 %v137_v53, %v59_v50 }
  0xed   :  { %v142_v55 = vcombine.low %v136_v52, %v138_v54 }
  0xef   :  { %157 = vst.sshfl [vmem:[%s259_s3] sm:$0x33 pattern:$0x76325410] %v142_v55 }

// kernel: seresnext_forward.24
= control target key start
LH: loop header
LB: loop body
LE: loop exit
PB: predicated region body
PF: predicated region fallthrough
CT: control target
= control target key end

     0   :  { %v338_v0 = vmov 0.0|0.0   ;;  %vm339_vm0 = vmmov 0   ;;  %v340_v4 = vmov 0.0   ;;  %vm25_vm1 = vcmask 519168   ;;  %s443_s1 = inlined_call_operand.vmem [shape: f32[64,16], index: 1, kind: input, shape index: {}]   ;;  %s444_s0 = inlined_call_operand.vmem [shape: f32[2,4,64], index: 0, kind: input, shape index: {}]   ;;  %s445_s3 = inlined_call_operand.vmem [shape: f32[16,64], index: 3, kind: input, shape index: {}]   ;;  %s446_s2 = inlined_call_operand.vmem [shape: f32[1,16], index: 2, kind: input, shape index: {}]   ;;  %s447_s4 = inlined_call_operand.vmem [shape: f32[1,64], index: 4, kind: input, shape index: {}]   ;;  %s448_s5 = inlined_call_operand.vmem [shape: f32[2,4,64], index: 5, kind: input, shape index: {}]   ;;  %s449_s6 = inlined_call_operand.vmem [shape: f32[2,4,64], index: 6, kind: output, shape index: {}]  }
   0x1   :  { %315 = vmatprep.subr.bf16.mxu0 %v338_v0  ;;  %v43_v1 = vld [vmem:[%s443_s1] sm:$0xff]  ;;  %v44_v2 = vld [vmem:[%s443_s1 + $0x8] sm:$0xff]  ;;  %v45_v3 = vld [vmem:[%s443_s1 + $0x10] sm:$0xff]  ;;  %305 = vmatprep.mubr.msk.f32.mxu0 %vm339_vm0, %v340_v4  ;;  %vm60_vm2 = vcmask 1041409   ;;  %vm62_vm3 = vcmask 523264   ;;  %vm145_vm4 = vcmask 130048   ;;  %v229_v50 = vlaneseq }
   0x2   :  { %v316_v5 = vpack.c.bf16 %v44_v2, %v43_v1  ;;  %v46_v6 = vld [vmem:[%s443_s1 + $0x18] sm:$0xff]  ;;  %327 = vmatprep.subr.bf16.mxu1 %v338_v0  ;;  %312 = vmatprep.mubr.msk.f32.mxu1 %vm339_vm0, %v340_v4  ;;  %v392_v7 = vld [vmem:[%s444_s0] sm:$0xf]  ;;  %v397_v9 = vld [vmem:[%s444_s0 + $0x4] sm:$0xf] }
   0x3   :  { %v319_v8 = vpack.c.bf16 %v46_v6, %v45_v3  ;;  %v26_v10 = vsel %vm25_vm1, %v392_v7, 0.0  ;;  %v47_v11 = vld [vmem:[%s443_s1 + $0x20] sm:$0xff]  ;;  %v48_v12 = vld [vmem:[%s443_s1 + $0x28] sm:$0xff]  ;;  %v33_v14 = vsel %vm25_vm1, %v397_v9, 0.0  ;;  %v49_v19 = vld [vmem:[%s443_s1 + $0x30] sm:$0xff]  ;;  %v230_v52 = vshrl.u32 %v229_v50, 7 }
   0x4   :  { %317 = vmatpush3.bf16.msra.mxu0 %v316_v5  ;;  %v27_v13 = vrot.slane %v26_v10, 4  ;;  %v34_v15 = vrot.slane %v33_v14, 4  ;;  %v322_v17 = vpack.c.bf16 %v48_v12, %v47_v11  ;;  %v50_v20 = vld [vmem:[%s443_s1 + $0x38] sm:$0xff]  ;;  %v136_v33 = vld [vmem:[%s445_s3] sm:$0xff]  ;;  %v137_v34 = vld [vmem:[%s445_s3 + $0x8] sm:$0xff] }
   0x5   :  { %318 = vmatprep.subr.bf16.mxu0 %v338_v0  ;;  %v325_v24 = vpack.c.bf16 %v50_v20, %v49_v19  ;;  %v328_v35 = vpack.c.bf16 %v137_v34, %v136_v33  ;;  %v272_v36 = vld [vmem:[%s446_s2] ss:$0 sm:$0xff]  ;;  %v341_v48 = vmov 1966171168   ;;  %v250_v56 = vsub.s32 0, %v230_v52 }
   0x6   :  { %v28_v16 = vadd.f32 %v27_v13, %v26_v10  ;;  %v35_v18 = vadd.f32 %v34_v15, %v33_v14  ;;  %v274_v41 = vld [vmem:[%s447_s4] ss:$0 sm:$0xff]  ;;  %v227_v49 = vunpack.c.l.s4 %v341_v48 }
   0x7   :  { %329 = vmatpush3.bf16.msra.mxu1 %v328_v35  ;;  %v260_v61 = vld [vmem:[%s448_s5] sm:$0xf] }
   0x8   :  { %320 = vmatpush3.bf16.msra.mxu0 %v319_v8  ;;  %v29_v21 = vrot.slane %v28_v16, 2  ;;  %v36_v22 = vrot.slane %v35_v18, 2  ;;  %v228_v51 = vunpack.c.0.s8 %v227_v49 }
   0x9   :  { %321 = vmatprep.subr.bf16.mxu0 %v338_v0 }
   0xa   :  { %v30_v23 = vadd.f32 %v29_v21, %v28_v16  ;;  %v37_v25 = vadd.f32 %v36_v22, %v35_v18  ;;  %v231_v53 = vsub.s32 %v228_v51, %v230_v52 }
   0xc   :  { %323 = vmatpush3.bf16.msra.mxu0 %v322_v17  ;;  %v31_v26 = vrot.slane %v30_v23, 1  ;;  %v38_v27 = vrot.slane %v37_v25, 1 }
   0xd   :  { %324 = vmatprep.subr.bf16.mxu0 %v338_v0  ;;  %v261_v0 = vld [vmem:[%s448_s5 + $0x4] sm:$0xf] }
   0xe   :  { %v32_v28 = vadd.f32 %v31_v26, %v30_v23  ;;  %v39_v29 = vadd.f32 %v38_v27, %v37_v25 }
  0x10   :  { %326 = vmatpush3.bf16.msra.mxu0 %v325_v24  ;;  %v41_v30 = vmul.f32 0.25, %v32_v28  ;;  %v42_v31 = vmul.f32 0.25, %v39_v29 }
  0x12   :  { %v61_v32 = vsel %vm60_vm2, %v42_v31, %v41_v30 }
  0x13   :  { %306 = vmatmul.mubr.msk.f32.vlgmr.msra.gmra.mrb[0].mxu0 %vm62_vm3, %v61_v32 }
  0xe6   :  { %v131_v37 = vpop.f32.mrb[0].mxu0 }
  0xe7   :  { %v132_v38 = vadd.f32 %v272_v36, %v131_v37  ;;  %v307_v39 = vpop.f32.mrb[1].mxu0 }
  0xe9   :  { %v135_v40 = vmax.f32 %v132_v38, 0.0 }
  0xeb   :  { %313 = vmatmul.mubr.msk.f32.vlgmr.msra.gmra.mrb[0].mxu1 %vm145_vm4, %v135_v40 }
 0x1be   :  { %v215_v42 = vpop.f32.mrb[0].mxu1 }
 0x1bf   :  { %v216_v43 = vadd.f32 %v274_v41, %v215_v42  ;;  %v314_v44 = vpop.f32.mrb[1].mxu1 }
 0x1c1   :  { %v276_v45 = vmul.f32 -1.442695, %v216_v43 }
 0x1c3   :  { %334 = vpow2.f32 %v276_v45 }
 0x1cd   :  { %v335_v46 = vpop.eup %334 }
 0x1ce   :  { %v222_v47 = vadd.f32 1.0, %v335_v46 }
 0x1d0   :  { %336 = vrcp.f32 %v222_v47 }
 0x1da   :  { %v337_v54 = vpop.eup %336 }
 0x1db   :  { %v232_v55 = vrot.slane %v337_v54, %v231_v53 }
 0x1dd   :  { %v233_v57 = vcombine.high %v232_v55, %v232_v55  ;;  %v240_v58 = vrot.slane %v232_v55, %v231_v53 }
 0x1df   :  { %v247_v59 = vrot.slane %v233_v57, %v231_v53  ;;  %v251_v60 = vrot.slane %v240_v58, %v250_v56 }
 0x1e1   :  { %v255_v62 = vrot.slane %v247_v59, %v250_v56  ;;  %v258_v63 = vmul.f32 %v251_v60, %v392_v7 }
 0x1e3   :  { %v259_v1 = vmul.f32 %v255_v62, %v397_v9  ;;  %v262_v2 = vadd.f32 %v260_v61, %v258_v63 }
 0x1e5   :  { %v263_v3 = vadd.f32 %v261_v0, %v259_v1  ;;  %v264_v4 = vmax.f32 %v262_v2, 0.0 }
 0x1e7   :  { %v265_v5 = vmax.f32 %v263_v3, 0.0  ;;  %266 = vst.msk [vmem:[%s449_s6] sm:$0xf] %vm25_vm1, %v264_v4 }
 0x1e9   :  { %267 = vst.msk [vmem:[%s449_s6 + $0x4] sm:$0xf] %vm25_vm1, %v265_v5 }

// kernel: seresnext_forward.22
= control target key start
LH: loop header
LB: loop body
LE: loop exit
PB: predicated region body
PF: predicated region fallthrough
CT: control target
= control target key end

     0   :  { %v347_v1 = vmov 0.0   ;;  %vm348_vm0 = vmmov 0   ;;  %vm178_vm1 = vcmask 261120   ;;  %s437_s1 = inlined_call_operand.vmem [shape: bf16[288,32], index: 1, kind: input, shape index: {}]   ;;  %s438_s0 = inlined_call_operand.vmem [shape: bf16[8,288], index: 0, kind: input, shape index: {}]   ;;  %s439_s2 = inlined_call_operand.vmem [shape: f32[1,32], index: 2, kind: input, shape index: {}]   ;;  %s440_s3 = inlined_call_operand.vmem [shape: f32[8,32], index: 3, kind: output, shape index: {}]  }
   0x1   :  { %v326_v0 = vld [vmem:[%s437_s1 + $0x40] sm:$0xff]   ;;  %316 = vmatprep.subr.bf16.mxu1 %v347_v1  ;;  %320 = vmatprep.mubr.msk.bf16.mxu1 %vm348_vm0, %v347_v1  ;;  %v328_v3 = vld [vmem:[%s437_s1 + $0x48] sm:$0xff]   ;;  %v330_v5 = vld [vmem:[%s437_s1 + $0x50] sm:$0xff]  }
   0x2   :  { %v327_v2 = vld [vmem:[%s437_s1] sm:$0xff]   ;;  %291 = vmatprep.subr.bf16.mxu0 %v326_v0  ;;  %v329_v4 = vld [vmem:[%s437_s1 + $0x8] sm:$0xff]   ;;  %v331_v6 = vld [vmem:[%s437_s1 + $0x10] sm:$0xff]  }
   0x3   :  { %292 = vmatpush3.bf16.msra.mxu0 %v327_v2  ;;  %v332_v7 = vld [vmem:[%s437_s1 + $0x58] sm:$0xff]   ;;  %v334_v9 = vld [vmem:[%s437_s1 + $0x60] sm:$0xff]   ;;  %v336_v12 = vld [vmem:[%s437_s1 + $0x68] sm:$0xff]  }
   0x4   :  { %293 = vmatprep.subr.bf16.mxu0 %v328_v3  ;;  %v333_v8 = vld [vmem:[%s437_s1 + $0x18] sm:$0xff]   ;;  %v340_v10 = vld [vmem:[%s437_s1 + $0x80] sm:$0xff]   ;;  %v346_v15 = vld [vmem:[%s437_s1 + $0x88] sm:$0xff]  }
   0x5   :  { %v335_v11 = vld [vmem:[%s437_s1 + $0x20] sm:$0xff]   ;;  %317 = vmatpush3.bf16.msra.mxu1 %v340_v10  ;;  %v337_v16 = vld [vmem:[%s437_s1 + $0x28] sm:$0xff]   ;;  %v338_v17 = vld [vmem:[%s437_s1 + $0x70] sm:$0xff]  }
   0x6   :  { %318 = vmatprep.subr.bf16.mxu1 %v347_v1  ;;  %v15_v13 = vld [vmem:[%s438_s0] sm:$0xff]  ;;  %v345_v18 = vld [vmem:[%s438_s0 + $0x8] ss:$0 sps:$4 sm:$0xff]   ;;  %v339_v19 = vld [vmem:[%s437_s1 + $0x30] sm:$0xff]  }
   0x7   :  { %294 = vmatpush3.bf16.msra.mxu0 %v329_v4  ;;  %v270_v14 = vcombine.high %v15_v13, %v15_v13  ;;  %v341_v20 = vld [vmem:[%s437_s1 + $0x78] sm:$0xff]   ;;  %v269_v22 = vcombine.low %v15_v13, %v15_v13  ;;  %v268_v29 = vld [vmem:[%s439_s2] ss:$0 sm:$0xff] }
   0x8   :  { %295 = vmatprep.subr.bf16.mxu0 %v330_v5  ;;  %v342_v21 = vld [vmem:[%s437_s1 + $0x38] sm:$0xff]  }
   0x9   :  { %214 = vmatprep.mubr.bf16.mxu0 %v270_v14  ;;  %319 = vmatpush3.bf16.msra.mxu1 %v346_v15 }
   0xb   :  { %296 = vmatpush3.bf16.msra.mxu0 %v331_v6 }
   0xc   :  { %297 = vmatprep.subr.bf16.mxu0 %v332_v7  ;;  %321 = vmatmul.mubr.msk.bf16.vlgmr.msra.gmra.mrb[0].mxu1 %vm178_vm1, %v345_v18 }
   0xf   :  { %298 = vmatpush3.bf16.msra.mxu0 %v333_v8 }
  0x10   :  { %299 = vmatprep.subr.bf16.mxu0 %v334_v9 }
  0x13   :  { %300 = vmatpush3.bf16.msra.mxu0 %v335_v11 }
  0x14   :  { %301 = vmatprep.subr.bf16.mxu0 %v336_v12 }
  0x17   :  { %302 = vmatpush3.bf16.msra.mxu0 %v337_v16 }
  0x18   :  { %303 = vmatprep.subr.bf16.mxu0 %v338_v17 }
  0x1b   :  { %304 = vmatpush3.bf16.msra.mxu0 %v339_v19 }
  0x1c   :  { %305 = vmatprep.subr.bf16.mxu0 %v341_v20 }
  0x1f   :  { %306 = vmatpush3.bf16.msra.mxu0 %v342_v21 }
  0x22   :  { %215 = vmatmul.mubr.bf16.vlgmr.msra.gmra.mrb[0].mxu0 %v269_v22 }
  0xdf   :  { %v256_v23 = vpop.f32.mrb[0].mxu1 }
  0xe0   :  { %v322_v24 = vpop.f32.mrb[1].mxu1 }
  0xe1   :  { %v259_v25 = vpop.f32.mrb[2].mxu1 }
  0xe2   :  { %v323_v26 = vpop.f32.mrb[3].mxu1 }
  0xf5   :  { %v307_v27 = vpop.f32.mrb[0].mxu0 }
  0xf6   :  { %v308_v28 = vpop.f32.mrb[1].mxu0 }
  0xf7   :  { %v309_v30 = vadd.f32 %v308_v28, %v307_v27  ;;  %v310_v31 = vpop.f32.mrb[2].mxu0 }
  0xf8   :  { %v311_v32 = vpop.f32.mrb[3].mxu0 }
  0xf9   :  { %v217_v33 = vadd.f32 %v309_v30, %v268_v29 }
  0xfb   :  { %v257_v34 = vadd.f32 %v256_v23, %v217_v33 }
  0xfd   :  { %v262_v35 = vmax.f32 %v257_v34, 0.0 }
  0xff   :  { %263 = vst.msk [vmem:[%s440_s3] sm:$0xff] %vm178_vm1, %v262_v35 }

</bundles_post_ra>
